<compile_context>
chip_gen: v5e
topology: v5e:2x2
jax: 0.10.0
libtpu: 0.0.40
codegen_flags: <defaults>
</compile_context>

<pallas_src>
import functools
import math

import jax
import jax.numpy as jnp
from jax.experimental import pallas as pl
from jax.experimental.pallas import tpu as pltpu


def _round_up(x, m):
    return ((x + m - 1) // m) * m


# ---------------------------------------------------------------------------
# Fused Pallas kernel
# ---------------------------------------------------------------------------
def _fused_lstm_kernel(*refs, num_layers, seq_len, batch_pad, hidden, unroll):
    """refs = (x2d, [w_ih_t, w_hh_t, b]*num_layers, w_out_t, b_out,   # inputs
               o,                                                      # output
               y_sc, gx_sc)                                            # scratch
    x2d    : (L*Np, D)    all timesteps, batch sublane-padded, flattened
    w_ih_t : (D_in, 4H)   input->hidden weights (pre-transposed)
    w_hh_t : (H, 4H)      hidden->hidden weights (pre-transposed)
    b      : (1, 4H)      b_ih + b_hh
    o      : (L*Np, Op)   lane-dense head output slab (sliced in wrapper)
    y_sc   : (L*Np, H)    per-layer activations (VMEM resident)
    gx_sc  : (L*Np, 4H)   staged input projection (VMEM resident)
    """
    x_ref = refs[0]
    layer_refs = refs[1:1 + 3 * num_layers]
    w_out_ref = refs[1 + 3 * num_layers]
    b_out_ref = refs[2 + 3 * num_layers]
    o_ref = refs[3 + 3 * num_layers]
    y_sc = refs[4 + 3 * num_layers]
    gx_sc = refs[5 + 3 * num_layers]

    L, Np, H = seq_len, batch_pad, hidden

    gates_lane_aligned = (H % 128 == 0)
    if not gates_lane_aligned:
        # H < 128: one full-tile select is cheaper than four sub-128-lane
        # slices + per-gate transcendentals (loop-invariant mask, hoisted).
        lane = jax.lax.broadcasted_iota(jnp.int32, (Np, 4 * H), 1)
        is_g_gate = (lane >= 2 * H) & (lane < 3 * H)

    for l in range(num_layers):
        w_ih = layer_refs[3 * l][...]                        # (D_in, 4H)
        w_hh = layer_refs[3 * l + 1][...]                    # (H, 4H)
        b = layer_refs[3 * l + 2][...].astype(jnp.float32)   # (1, 4H)

        cur = x_ref[...] if l == 0 else y_sc[...]            # (L*Np, D_in)

        # Hoisted input projection + bias: one MXU matmul for all L timesteps,
        # staged into VMEM scratch (not a long-lived SSA value).
        gx_sc[...] = (
            jnp.dot(cur.astype(w_ih.dtype), w_ih,
                    preferred_element_type=jnp.float32) + b)

        def step(t, carry, _w_hh=w_hh):
            h, c = carry
            r0 = pl.multiple_of(t * Np, Np)
            gates = gx_sc[pl.ds(r0, Np), :] + jnp.dot(
                h.astype(_w_hh.dtype), _w_hh,
                preferred_element_type=jnp.float32)           # (Np, 4H)
            if gates_lane_aligned:
                i_g = jax.nn.sigmoid(gates[:, 0 * H:1 * H])
                f_g = jax.nn.sigmoid(gates[:, 1 * H:2 * H])
                g_g = jnp.tanh(gates[:, 2 * H:3 * H])
                o_g = jax.nn.sigmoid(gates[:, 3 * H:4 * H])
            else:
                act = jnp.where(is_g_gate, jnp.tanh(gates), jax.nn.sigmoid(gates))
                i_g = act[:, 0 * H:1 * H]
                f_g = act[:, 1 * H:2 * H]
                g_g = act[:, 2 * H:3 * H]
                o_g = act[:, 3 * H:4 * H]
            c = f_g * c + i_g * g_g
            h = o_g * jnp.tanh(c)
            # Full sublane-aligned (Np, H) store — no single-row masked stores
            # on the serial critical path of the recurrence.
            y_sc[pl.ds(r0, Np), :] = h
            return h, c

        h0 = jnp.zeros((Np, H), jnp.float32)
        c0 = jnp.zeros((Np, H), jnp.float32)
        jax.lax.fori_loop(0, L, step, (h0, c0), unroll=unroll)

    # Head over all rows into a lane-dense slab; the wrapper slices the
    # original row N-1 per timestep (reference's o[:, -1, :] semantics).
    w_out = w_out_ref[...]
    b_out = b_out_ref[...].astype(jnp.float32)
    o_ref[...] = (
        jnp.dot(y_sc[...].astype(w_out.dtype), w_out,
                preferred_element_type=jnp.float32) + b_out
    ).astype(o_ref.dtype)


# ---------------------------------------------------------------------------
# Wrapper
# ---------------------------------------------------------------------------
def lstm_model_forward(x, params, *, weight_dtype=jnp.float32):
    """Replicates LSTM.forward: ESN(identity) -> nn.LSTM(num_layers) -> Linear -> [:, -1, :]."""
    L, N, D = x.shape
    layers = params["lstm_layers"]
    num_layers = len(layers)
    H = layers[0]["w_hh_t"].shape[0]
    O = params["w_out_t"].shape[1]

    # Sublane-pad the batch (f32 sublane tile = 8); lane-pad the head output.
    Np = _round_up(max(N, 1), 8)
    Op = _round_up(max(O, 1), 128)

    x_pad = jnp.pad(x.astype(jnp.float32), ((0, 0), (0, Np - N), (0, 0)))
    x2d = x_pad.reshape(L * Np, D)

    w_out_p = jnp.pad(params["w_out_t"], ((0, 0), (0, Op - O))).astype(weight_dtype)
    b_out_p = jnp.pad(params["b_out"], ((0, 0), (0, Op - O))).astype(jnp.float32)

    inputs = [x2d]
    in_specs = [pl.BlockSpec((L * Np, D), lambda: (0, 0))]
    for layer in layers:
        d_in = layer["w_ih_t"].shape[0]
        inputs += [layer["w_ih_t"].astype(weight_dtype),
                   layer["w_hh_t"].astype(weight_dtype),
                   layer["b"].astype(jnp.float32)]
        in_specs += [
            pl.BlockSpec((d_in, 4 * H), lambda: (0, 0)),
            pl.BlockSpec((H, 4 * H), lambda: (0, 0)),
            pl.BlockSpec((1, 4 * H), lambda: (0, 0)),
        ]
    inputs += [w_out_p, b_out_p]
    in_specs += [
        pl.BlockSpec((H, Op), lambda: (0, 0)),
        pl.BlockSpec((1, Op), lambda: (0, 0)),
    ]

    # Unroll factor (4-8) that divides L exactly: LLO scheduling visibility
    # without unbounded live ranges / code size.
    unroll = next(u for u in (8, 4, 2, 1) if L % u == 0)

    kernel = functools.partial(
        _fused_lstm_kernel, num_layers=num_layers, seq_len=L,
        batch_pad=Np, hidden=H, unroll=unroll)

    scratch_shapes = [
        pltpu.VMEM((L * Np, H), jnp.float32),        # per-layer activations
        pltpu.VMEM((L * Np, 4 * H), jnp.float32),    # staged input projection
    ]

    # vmem limit sized from the actual buffers (double-buffered I/O + scratch).
    def _nbytes(a):
        return math.prod(a.shape) * jnp.dtype(a.dtype).itemsize
    io_bytes = sum(_nbytes(a) for a in inputs) + L * Np * Op * 4
    scratch_bytes = (L * Np * H + L * Np * 4 * H) * 4
    vmem_limit = int(min(max(2 * io_bytes + scratch_bytes + (8 << 20), 32 << 20),
                         100 << 20))

    out_full = pl.pallas_call(
        kernel,
        out_shape=jax.ShapeDtypeStruct((L * Np, Op), jnp.float32),
        grid=(),
        in_specs=in_specs,
        out_specs=pl.BlockSpec((L * Np, Op), lambda: (0, 0)),
        scratch_shapes=scratch_shapes,
        compiler_params=pltpu.CompilerParams(vmem_limit_bytes=vmem_limit),
    )(*inputs)

    # Reference head: o = Linear(y)[:, -1, :] — the last *batch* element at
    # every timestep → (L, O). Slice the ORIGINAL row N-1 (not the padded last
    # row) and the real output lanes.
    return out_full.reshape(L, Np, Op)[:, N - 1, :O]


# ---------------------------------------------------------------------------
# Deterministic parameter construction (matches nn.LSTM / nn.Linear shapes)
# ---------------------------------------------------------------------------
def make_params(key, input_size, num_hidden, num_layers, output_size):
    params = {"lstm_layers": []}
    k = 1.0 / jnp.sqrt(num_hidden)
    for l in range(num_layers):
        d_in = input_size if l == 0 else num_hidden
        key, k1, k2, k3, k4 = jax.random.split(key, 5)
        w_ih = jax.random.uniform(k1, (4 * num_hidden, d_in), jnp.float32, -k, k)
        w_hh = jax.random.uniform(k2, (4 * num_hidden, num_hidden), jnp.float32, -k, k)
        b_ih = jax.random.uniform(k3, (4 * num_hidden,), jnp.float32, -k, k)
        b_hh = jax.random.uniform(k4, (4 * num_hidden,), jnp.float32, -k, k)
        params["lstm_layers"].append({
            "w_ih_t": w_ih.T,                       # (d_in, 4H)
            "w_hh_t": w_hh.T,                       # (H, 4H)
            "b": (b_ih + b_hh)[None, :],            # (1, 4H)
        })
    key, k5, k6 = jax.random.split(key, 3)
    w_out = jax.random.uniform(k5, (output_size, num_hidden), jnp.float32, -k, k)
    b_out = jax.random.uniform(k6, (output_size,), jnp.float32, -k, k)
    params["w_out_t"] = w_out.T                     # (H, output_size)
    params["b_out"] = b_out[None, :]                # (1, output_size)
    return params


# ---------------------------------------------------------------------------
# Pure-JAX reference (for sanity check)
# ---------------------------------------------------------------------------
def reference_forward(x, params):
    y = x
    for layer in params["lstm_layers"]:
        L, N, _ = y.shape
        H = layer["w_hh_t"].shape[0]
        h = jnp.zeros((N, H), jnp.float32)
        c = jnp.zeros((N, H), jnp.float32)
        outs = []
        for t in range(L):
            gates = y[t] @ layer["w_ih_t"] + h @ layer["w_hh_t"] + layer["b"]
            i = jax.nn.sigmoid(gates[:, 0 * H:1 * H])
            f = jax.nn.sigmoid(gates[:, 1 * H:2 * H])
            g = jnp.tanh(gates[:, 2 * H:3 * H])
            o = jax.nn.sigmoid(gates[:, 3 * H:4 * H])
            c = f * c + i * g
            h = o * jnp.tanh(c)
            outs.append(h)
        y = jnp.stack(outs, axis=0)
    return y[:, -1, :] @ params["w_out_t"] + params["b_out"]


if __name__ == "__main__":
    # Small shapes consistent with the module's forward pass.
    L, N = 8, 2                 # seq_len, batch (nn.LSTM default layout)
    input_size = 16
    num_hidden = 32
    num_layers = 2
    output_size = 4

    key = jax.random.PRNGKey(0)
    key, kx = jax.random.split(key)
    x = jax.random.normal(kx, (L, N, input_size), jnp.float32)

    params = make_params(key, input_size, num_hidden, num_layers, output_size)

    out = lstm_model_forward(x, params)
    out = jax.block_until_ready(out)

    ref = reference_forward(x, params)
    assert out.shape == (L, output_size), out.shape
    assert jnp.allclose(out, ref, atol=1e-4, rtol=1e-4), float(jnp.max(jnp.abs(out - ref)))

    print("KERNEL_OK")
</pallas_src>

<mosaic_0001>
module attributes {stable_mosaic.version = 11 : i64} {
  func.func @_fused_lstm_kernel(%arg0: memref<64x16xf32, #tpu.memory_space<vmem>>, %arg1: memref<16x128xf32, #tpu.memory_space<vmem>>, %arg2: memref<32x128xf32, #tpu.memory_space<vmem>>, %arg3: memref<1x128xf32, #tpu.memory_space<vmem>>, %arg4: memref<32x128xf32, #tpu.memory_space<vmem>>, %arg5: memref<32x128xf32, #tpu.memory_space<vmem>>, %arg6: memref<1x128xf32, #tpu.memory_space<vmem>>, %arg7: memref<32x128xf32, #tpu.memory_space<vmem>>, %arg8: memref<1x128xf32, #tpu.memory_space<vmem>>, %arg9: memref<64x128xf32, #tpu.memory_space<vmem>>, %arg10: memref<64x32xf32, #tpu.memory_space<vmem>>, %arg11: memref<64x128xf32, #tpu.memory_space<vmem>>) attributes {dimension_semantics = [], scalar_prefetch = 0 : i64, scratch_operands = 2 : i64, tpu.core_type = #tpu.core_type<tc>} {
    %0 = tpu.iota {dimensions = array<i32: 1>} : vector<8x128xi32>
    %c64_i32 = arith.constant 64 : i32
    %1 = vector.broadcast %c64_i32 : i32 to vector<8x128xi32>
    %2 = arith.cmpi sge, %0, %1 : vector<8x128xi32>
    %c96_i32 = arith.constant 96 : i32
    %3 = vector.broadcast %c96_i32 : i32 to vector<8x128xi32>
    %4 = arith.cmpi slt, %0, %3 : vector<8x128xi32>
    %5 = arith.andi %2, %4 : vector<8x128xi1>
    %c0 = arith.constant 0 : index
    %c0_0 = arith.constant 0 : index
    %6 = vector.load %arg1[%c0, %c0_0] : memref<16x128xf32, #tpu.memory_space<vmem>>, vector<16x128xf32>
    %c0_1 = arith.constant 0 : index
    %c0_2 = arith.constant 0 : index
    %7 = vector.load %arg2[%c0_1, %c0_2] : memref<32x128xf32, #tpu.memory_space<vmem>>, vector<32x128xf32>
    %c0_3 = arith.constant 0 : index
    %c0_4 = arith.constant 0 : index
    %8 = vector.load %arg3[%c0_3, %c0_4] : memref<1x128xf32, #tpu.memory_space<vmem>>, vector<1x128xf32>
    %c0_5 = arith.constant 0 : index
    %c0_6 = arith.constant 0 : index
    %9 = vector.load %arg0[%c0_5, %c0_6] : memref<64x16xf32, #tpu.memory_space<vmem>>, vector<64x16xf32>
    %cst = arith.constant dense<0.000000e+00> : vector<64x128xf32>
    %10 = tpu.matmul %9, %6, %cst {dimension_numbers = #tpu.dot_dimension_numbers<[1], [0], [0], [1], [0, 0, 1, 1], [], []>} : vector<64x16xf32>, vector<16x128xf32>, vector<64x128xf32> -> vector<64x128xf32>
    %11 = vector.broadcast %8 : vector<1x128xf32> to vector<64x128xf32>
    %12 = arith.addf %10, %11 : vector<64x128xf32>
    %c0_7 = arith.constant 0 : index
    %c0_8 = arith.constant 0 : index
    %13 = vector.load %arg11[%c0_7, %c0_8] : memref<64x128xf32, #tpu.memory_space<vmem>>, vector<64x128xf32>
    tpu.vector_store %arg11[%c0_7, %c0_8], %12 {strides = array<i32>} : memref<64x128xf32, #tpu.memory_space<vmem>>, vector<64x128xf32>,
    %cst_9 = arith.constant 0.000000e+00 : f32
    %14 = vector.broadcast %cst_9 : f32 to vector<8x32xf32>
    %cst_10 = arith.constant 0.000000e+00 : f32
    %15 = vector.broadcast %cst_10 : f32 to vector<8x32xf32>
    %c0_i32 = arith.constant 0 : i32
    %c8_i32 = arith.constant 8 : i32
    %16 = arith.muli %c0_i32, %c8_i32 : i32
    %17 = tpu.assume_multiple %16, 8 : i32
    %18 = arith.index_cast %17 : i32 to index
    %c0_11 = arith.constant 0 : index
    %19 = vector.load %arg11[%18, %c0_11] : memref<64x128xf32, #tpu.memory_space<vmem>>, vector<8x128xf32>
    %cst_12 = arith.constant dense<0.000000e+00> : vector<8x128xf32>
    %20 = tpu.matmul %14, %7, %cst_12 {dimension_numbers = #tpu.dot_dimension_numbers<[1], [0], [0], [1], [0, 0, 1, 1], [], []>} : vector<8x32xf32>, vector<32x128xf32>, vector<8x128xf32> -> vector<8x128xf32>
    %21 = arith.addf %19, %20 : vector<8x128xf32>
    %22 = math.tanh %21 : vector<8x128xf32>
    %23 = arith.negf %21 : vector<8x128xf32>
    %24 = math.exp %23 : vector<8x128xf32>
    %cst_13 = arith.constant 1.000000e+00 : f32
    %25 = vector.broadcast %cst_13 : f32 to vector<8x128xf32>
    %26 = arith.addf %25, %24 : vector<8x128xf32>
    %27 = arith.divf %25, %26 : vector<8x128xf32>
    %28 = arith.select %5, %22, %27 : vector<8x128xi1>, vector<8x128xf32>
    %29 = vector.extract_strided_slice %28 {offsets = [0, 0], sizes = [8, 32], strides = [1, 1]} : vector<8x128xf32> to vector<8x32xf32>
    %30 = vector.extract_strided_slice %28 {offsets = [0, 32], sizes = [8, 32], strides = [1, 1]} : vector<8x128xf32> to vector<8x32xf32>
    %31 = vector.extract_strided_slice %28 {offsets = [0, 64], sizes = [8, 32], strides = [1, 1]} : vector<8x128xf32> to vector<8x32xf32>
    %32 = vector.extract_strided_slice %28 {offsets = [0, 96], sizes = [8, 32], strides = [1, 1]} : vector<8x128xf32> to vector<8x32xf32>
    %33 = arith.mulf %30, %15 : vector<8x32xf32>
    %34 = arith.mulf %29, %31 : vector<8x32xf32>
    %35 = arith.addf %33, %34 : vector<8x32xf32>
    %36 = math.tanh %35 : vector<8x32xf32>
    %37 = arith.mulf %32, %36 : vector<8x32xf32>
    %38 = arith.index_cast %17 : i32 to index
    %c0_14 = arith.constant 0 : index
    %39 = vector.load %arg10[%38, %c0_14] : memref<64x32xf32, #tpu.memory_space<vmem>>, vector<8x32xf32>
    tpu.vector_store %arg10[%38, %c0_14], %37 {strides = array<i32>} : memref<64x32xf32, #tpu.memory_space<vmem>>, vector<8x32xf32>,
    %c1_i32 = arith.constant 1 : i32
    %c8_i32_15 = arith.constant 8 : i32
    %40 = arith.muli %c1_i32, %c8_i32_15 : i32
    %41 = tpu.assume_multiple %40, 8 : i32
    %42 = arith.index_cast %41 : i32 to index
    %c0_16 = arith.constant 0 : index
    %43 = vector.load %arg11[%42, %c0_16] : memref<64x128xf32, #tpu.memory_space<vmem>>, vector<8x128xf32>
    %cst_17 = arith.constant dense<0.000000e+00> : vector<8x128xf32>
    %44 = tpu.matmul %37, %7, %cst_17 {dimension_numbers = #tpu.dot_dimension_numbers<[1], [0], [0], [1], [0, 0, 1, 1], [], []>} : vector<8x32xf32>, vector<32x128xf32>, vector<8x128xf32> -> vector<8x128xf32>
    %45 = arith.addf %43, %44 : vector<8x128xf32>
    %46 = math.tanh %45 : vector<8x128xf32>
    %47 = arith.negf %45 : vector<8x128xf32>
    %48 = math.exp %47 : vector<8x128xf32>
    %cst_18 = arith.constant 1.000000e+00 : f32
    %49 = vector.broadcast %cst_18 : f32 to vector<8x128xf32>
    %50 = arith.addf %49, %48 : vector<8x128xf32>
    %51 = arith.divf %49, %50 : vector<8x128xf32>
    %52 = arith.select %5, %46, %51 : vector<8x128xi1>, vector<8x128xf32>
    %53 = vector.extract_strided_slice %52 {offsets = [0, 0], sizes = [8, 32], strides = [1, 1]} : vector<8x128xf32> to vector<8x32xf32>
    %54 = vector.extract_strided_slice %52 {offsets = [0, 32], sizes = [8, 32], strides = [1, 1]} : vector<8x128xf32> to vector<8x32xf32>
    %55 = vector.extract_strided_slice %52 {offsets = [0, 64], sizes = [8, 32], strides = [1, 1]} : vector<8x128xf32> to vector<8x32xf32>
    %56 = vector.extract_strided_slice %52 {offsets = [0, 96], sizes = [8, 32], strides = [1, 1]} : vector<8x128xf32> to vector<8x32xf32>
    %57 = arith.mulf %54, %35 : vector<8x32xf32>
    %58 = arith.mulf %53, %55 : vector<8x32xf32>
    %59 = arith.addf %57, %58 : vector<8x32xf32>
    %60 = math.tanh %59 : vector<8x32xf32>
    %61 = arith.mulf %56, %60 : vector<8x32xf32>
    %62 = arith.index_cast %41 : i32 to index
    %c0_19 = arith.constant 0 : index
    %63 = vector.load %arg10[%62, %c0_19] : memref<64x32xf32, #tpu.memory_space<vmem>>, vector<8x32xf32>
    tpu.vector_store %arg10[%62, %c0_19], %61 {strides = array<i32>} : memref<64x32xf32, #tpu.memory_space<vmem>>, vector<8x32xf32>,
    %c2_i32 = arith.constant 2 : i32
    %c8_i32_20 = arith.constant 8 : i32
    %64 = arith.muli %c2_i32, %c8_i32_20 : i32
    %65 = tpu.assume_multiple %64, 8 : i32
    %66 = arith.index_cast %65 : i32 to index
    %c0_21 = arith.constant 0 : index
    %67 = vector.load %arg11[%66, %c0_21] : memref<64x128xf32, #tpu.memory_space<vmem>>, vector<8x128xf32>
    %cst_22 = arith.constant dense<0.000000e+00> : vector<8x128xf32>
    %68 = tpu.matmul %61, %7, %cst_22 {dimension_numbers = #tpu.dot_dimension_numbers<[1], [0], [0], [1], [0, 0, 1, 1], [], []>} : vector<8x32xf32>, vector<32x128xf32>, vector<8x128xf32> -> vector<8x128xf32>
    %69 = arith.addf %67, %68 : vector<8x128xf32>
    %70 = math.tanh %69 : vector<8x128xf32>
    %71 = arith.negf %69 : vector<8x128xf32>
    %72 = math.exp %71 : vector<8x128xf32>
    %cst_23 = arith.constant 1.000000e+00 : f32
    %73 = vector.broadcast %cst_23 : f32 to vector<8x128xf32>
    %74 = arith.addf %73, %72 : vector<8x128xf32>
    %75 = arith.divf %73, %74 : vector<8x128xf32>
    %76 = arith.select %5, %70, %75 : vector<8x128xi1>, vector<8x128xf32>
    %77 = vector.extract_strided_slice %76 {offsets = [0, 0], sizes = [8, 32], strides = [1, 1]} : vector<8x128xf32> to vector<8x32xf32>
    %78 = vector.extract_strided_slice %76 {offsets = [0, 32], sizes = [8, 32], strides = [1, 1]} : vector<8x128xf32> to vector<8x32xf32>
    %79 = vector.extract_strided_slice %76 {offsets = [0, 64], sizes = [8, 32], strides = [1, 1]} : vector<8x128xf32> to vector<8x32xf32>
    %80 = vector.extract_strided_slice %76 {offsets = [0, 96], sizes = [8, 32], strides = [1, 1]} : vector<8x128xf32> to vector<8x32xf32>
    %81 = arith.mulf %78, %59 : vector<8x32xf32>
    %82 = arith.mulf %77, %79 : vector<8x32xf32>
    %83 = arith.addf %81, %82 : vector<8x32xf32>
    %84 = math.tanh %83 : vector<8x32xf32>
    %85 = arith.mulf %80, %84 : vector<8x32xf32>
    %86 = arith.index_cast %65 : i32 to index
    %c0_24 = arith.constant 0 : index
    %87 = vector.load %arg10[%86, %c0_24] : memref<64x32xf32, #tpu.memory_space<vmem>>, vector<8x32xf32>
    tpu.vector_store %arg10[%86, %c0_24], %85 {strides = array<i32>} : memref<64x32xf32, #tpu.memory_space<vmem>>, vector<8x32xf32>,
    %c3_i32 = arith.constant 3 : i32
    %c8_i32_25 = arith.constant 8 : i32
    %88 = arith.muli %c3_i32, %c8_i32_25 : i32
    %89 = tpu.assume_multiple %88, 8 : i32
    %90 = arith.index_cast %89 : i32 to index
    %c0_26 = arith.constant 0 : index
    %91 = vector.load %arg11[%90, %c0_26] : memref<64x128xf32, #tpu.memory_space<vmem>>, vector<8x128xf32>
    %cst_27 = arith.constant dense<0.000000e+00> : vector<8x128xf32>
    %92 = tpu.matmul %85, %7, %cst_27 {dimension_numbers = #tpu.dot_dimension_numbers<[1], [0], [0], [1], [0, 0, 1, 1], [], []>} : vector<8x32xf32>, vector<32x128xf32>, vector<8x128xf32> -> vector<8x128xf32>
    %93 = arith.addf %91, %92 : vector<8x128xf32>
    %94 = math.tanh %93 : vector<8x128xf32>
    %95 = arith.negf %93 : vector<8x128xf32>
    %96 = math.exp %95 : vector<8x128xf32>
    %cst_28 = arith.constant 1.000000e+00 : f32
    %97 = vector.broadcast %cst_28 : f32 to vector<8x128xf32>
    %98 = arith.addf %97, %96 : vector<8x128xf32>
    %99 = arith.divf %97, %98 : vector<8x128xf32>
    %100 = arith.select %5, %94, %99 : vector<8x128xi1>, vector<8x128xf32>
    %101 = vector.extract_strided_slice %100 {offsets = [0, 0], sizes = [8, 32], strides = [1, 1]} : vector<8x128xf32> to vector<8x32xf32>
    %102 = vector.extract_strided_slice %100 {offsets = [0, 32], sizes = [8, 32], strides = [1, 1]} : vector<8x128xf32> to vector<8x32xf32>
    %103 = vector.extract_strided_slice %100 {offsets = [0, 64], sizes = [8, 32], strides = [1, 1]} : vector<8x128xf32> to vector<8x32xf32>
    %104 = vector.extract_strided_slice %100 {offsets = [0, 96], sizes = [8, 32], strides = [1, 1]} : vector<8x128xf32> to vector<8x32xf32>
    %105 = arith.mulf %102, %83 : vector<8x32xf32>
    %106 = arith.mulf %101, %103 : vector<8x32xf32>
    %107 = arith.addf %105, %106 : vector<8x32xf32>
    %108 = math.tanh %107 : vector<8x32xf32>
    %109 = arith.mulf %104, %108 : vector<8x32xf32>
    %110 = arith.index_cast %89 : i32 to index
    %c0_29 = arith.constant 0 : index
    %111 = vector.load %arg10[%110, %c0_29] : memref<64x32xf32, #tpu.memory_space<vmem>>, vector<8x32xf32>
    tpu.vector_store %arg10[%110, %c0_29], %109 {strides = array<i32>} : memref<64x32xf32, #tpu.memory_space<vmem>>, vector<8x32xf32>,
    %c4_i32 = arith.constant 4 : i32
    %c8_i32_30 = arith.constant 8 : i32
    %112 = arith.muli %c4_i32, %c8_i32_30 : i32
    %113 = tpu.assume_multiple %112, 8 : i32
    %114 = arith.index_cast %113 : i32 to index
    %c0_31 = arith.constant 0 : index
    %115 = vector.load %arg11[%114, %c0_31] : memref<64x128xf32, #tpu.memory_space<vmem>>, vector<8x128xf32>
    %cst_32 = arith.constant dense<0.000000e+00> : vector<8x128xf32>
    %116 = tpu.matmul %109, %7, %cst_32 {dimension_numbers = #tpu.dot_dimension_numbers<[1], [0], [0], [1], [0, 0, 1, 1], [], []>} : vector<8x32xf32>, vector<32x128xf32>, vector<8x128xf32> -> vector<8x128xf32>
    %117 = arith.addf %115, %116 : vector<8x128xf32>
    %118 = math.tanh %117 : vector<8x128xf32>
    %119 = arith.negf %117 : vector<8x128xf32>
    %120 = math.exp %119 : vector<8x128xf32>
    %cst_33 = arith.constant 1.000000e+00 : f32
    %121 = vector.broadcast %cst_33 : f32 to vector<8x128xf32>
    %122 = arith.addf %121, %120 : vector<8x128xf32>
    %123 = arith.divf %121, %122 : vector<8x128xf32>
    %124 = arith.select %5, %118, %123 : vector<8x128xi1>, vector<8x128xf32>
    %125 = vector.extract_strided_slice %124 {offsets = [0, 0], sizes = [8, 32], strides = [1, 1]} : vector<8x128xf32> to vector<8x32xf32>
    %126 = vector.extract_strided_slice %124 {offsets = [0, 32], sizes = [8, 32], strides = [1, 1]} : vector<8x128xf32> to vector<8x32xf32>
    %127 = vector.extract_strided_slice %124 {offsets = [0, 64], sizes = [8, 32], strides = [1, 1]} : vector<8x128xf32> to vector<8x32xf32>
    %128 = vector.extract_strided_slice %124 {offsets = [0, 96], sizes = [8, 32], strides = [1, 1]} : vector<8x128xf32> to vector<8x32xf32>
    %129 = arith.mulf %126, %107 : vector<8x32xf32>
    %130 = arith.mulf %125, %127 : vector<8x32xf32>
    %131 = arith.addf %129, %130 : vector<8x32xf32>
    %132 = math.tanh %131 : vector<8x32xf32>
    %133 = arith.mulf %128, %132 : vector<8x32xf32>
    %134 = arith.index_cast %113 : i32 to index
    %c0_34 = arith.constant 0 : index
    %135 = vector.load %arg10[%134, %c0_34] : memref<64x32xf32, #tpu.memory_space<vmem>>, vector<8x32xf32>
    tpu.vector_store %arg10[%134, %c0_34], %133 {strides = array<i32>} : memref<64x32xf32, #tpu.memory_space<vmem>>, vector<8x32xf32>,
    %c5_i32 = arith.constant 5 : i32
    %c8_i32_35 = arith.constant 8 : i32
    %136 = arith.muli %c5_i32, %c8_i32_35 : i32
    %137 = tpu.assume_multiple %136, 8 : i32
    %138 = arith.index_cast %137 : i32 to index
    %c0_36 = arith.constant 0 : index
    %139 = vector.load %arg11[%138, %c0_36] : memref<64x128xf32, #tpu.memory_space<vmem>>, vector<8x128xf32>
    %cst_37 = arith.constant dense<0.000000e+00> : vector<8x128xf32>
    %140 = tpu.matmul %133, %7, %cst_37 {dimension_numbers = #tpu.dot_dimension_numbers<[1], [0], [0], [1], [0, 0, 1, 1], [], []>} : vector<8x32xf32>, vector<32x128xf32>, vector<8x128xf32> -> vector<8x128xf32>
    %141 = arith.addf %139, %140 : vector<8x128xf32>
    %142 = math.tanh %141 : vector<8x128xf32>
    %143 = arith.negf %141 : vector<8x128xf32>
    %144 = math.exp %143 : vector<8x128xf32>
    %cst_38 = arith.constant 1.000000e+00 : f32
    %145 = vector.broadcast %cst_38 : f32 to vector<8x128xf32>
    %146 = arith.addf %145, %144 : vector<8x128xf32>
    %147 = arith.divf %145, %146 : vector<8x128xf32>
    %148 = arith.select %5, %142, %147 : vector<8x128xi1>, vector<8x128xf32>
    %149 = vector.extract_strided_slice %148 {offsets = [0, 0], sizes = [8, 32], strides = [1, 1]} : vector<8x128xf32> to vector<8x32xf32>
    %150 = vector.extract_strided_slice %148 {offsets = [0, 32], sizes = [8, 32], strides = [1, 1]} : vector<8x128xf32> to vector<8x32xf32>
    %151 = vector.extract_strided_slice %148 {offsets = [0, 64], sizes = [8, 32], strides = [1, 1]} : vector<8x128xf32> to vector<8x32xf32>
    %152 = vector.extract_strided_slice %148 {offsets = [0, 96], sizes = [8, 32], strides = [1, 1]} : vector<8x128xf32> to vector<8x32xf32>
    %153 = arith.mulf %150, %131 : vector<8x32xf32>
    %154 = arith.mulf %149, %151 : vector<8x32xf32>
    %155 = arith.addf %153, %154 : vector<8x32xf32>
    %156 = math.tanh %155 : vector<8x32xf32>
    %157 = arith.mulf %152, %156 : vector<8x32xf32>
    %158 = arith.index_cast %137 : i32 to index
    %c0_39 = arith.constant 0 : index
    %159 = vector.load %arg10[%158, %c0_39] : memref<64x32xf32, #tpu.memory_space<vmem>>, vector<8x32xf32>
    tpu.vector_store %arg10[%158, %c0_39], %157 {strides = array<i32>} : memref<64x32xf32, #tpu.memory_space<vmem>>, vector<8x32xf32>,
    %c6_i32 = arith.constant 6 : i32
    %c8_i32_40 = arith.constant 8 : i32
    %160 = arith.muli %c6_i32, %c8_i32_40 : i32
    %161 = tpu.assume_multiple %160, 8 : i32
    %162 = arith.index_cast %161 : i32 to index
    %c0_41 = arith.constant 0 : index
    %163 = vector.load %arg11[%162, %c0_41] : memref<64x128xf32, #tpu.memory_space<vmem>>, vector<8x128xf32>
    %cst_42 = arith.constant dense<0.000000e+00> : vector<8x128xf32>
    %164 = tpu.matmul %157, %7, %cst_42 {dimension_numbers = #tpu.dot_dimension_numbers<[1], [0], [0], [1], [0, 0, 1, 1], [], []>} : vector<8x32xf32>, vector<32x128xf32>, vector<8x128xf32> -> vector<8x128xf32>
    %165 = arith.addf %163, %164 : vector<8x128xf32>
    %166 = math.tanh %165 : vector<8x128xf32>
    %167 = arith.negf %165 : vector<8x128xf32>
    %168 = math.exp %167 : vector<8x128xf32>
    %cst_43 = arith.constant 1.000000e+00 : f32
    %169 = vector.broadcast %cst_43 : f32 to vector<8x128xf32>
    %170 = arith.addf %169, %168 : vector<8x128xf32>
    %171 = arith.divf %169, %170 : vector<8x128xf32>
    %172 = arith.select %5, %166, %171 : vector<8x128xi1>, vector<8x128xf32>
    %173 = vector.extract_strided_slice %172 {offsets = [0, 0], sizes = [8, 32], strides = [1, 1]} : vector<8x128xf32> to vector<8x32xf32>
    %174 = vector.extract_strided_slice %172 {offsets = [0, 32], sizes = [8, 32], strides = [1, 1]} : vector<8x128xf32> to vector<8x32xf32>
    %175 = vector.extract_strided_slice %172 {offsets = [0, 64], sizes = [8, 32], strides = [1, 1]} : vector<8x128xf32> to vector<8x32xf32>
    %176 = vector.extract_strided_slice %172 {offsets = [0, 96], sizes = [8, 32], strides = [1, 1]} : vector<8x128xf32> to vector<8x32xf32>
    %177 = arith.mulf %174, %155 : vector<8x32xf32>
    %178 = arith.mulf %173, %175 : vector<8x32xf32>
    %179 = arith.addf %177, %178 : vector<8x32xf32>
    %180 = math.tanh %179 : vector<8x32xf32>
    %181 = arith.mulf %176, %180 : vector<8x32xf32>
    %182 = arith.index_cast %161 : i32 to index
    %c0_44 = arith.constant 0 : index
    %183 = vector.load %arg10[%182, %c0_44] : memref<64x32xf32, #tpu.memory_space<vmem>>, vector<8x32xf32>
    tpu.vector_store %arg10[%182, %c0_44], %181 {strides = array<i32>} : memref<64x32xf32, #tpu.memory_space<vmem>>, vector<8x32xf32>,
    %c7_i32 = arith.constant 7 : i32
    %c8_i32_45 = arith.constant 8 : i32
    %184 = arith.muli %c7_i32, %c8_i32_45 : i32
    %185 = tpu.assume_multiple %184, 8 : i32
    %186 = arith.index_cast %185 : i32 to index
    %c0_46 = arith.constant 0 : index
    %187 = vector.load %arg11[%186, %c0_46] : memref<64x128xf32, #tpu.memory_space<vmem>>, vector<8x128xf32>
    %cst_47 = arith.constant dense<0.000000e+00> : vector<8x128xf32>
    %188 = tpu.matmul %181, %7, %cst_47 {dimension_numbers = #tpu.dot_dimension_numbers<[1], [0], [0], [1], [0, 0, 1, 1], [], []>} : vector<8x32xf32>, vector<32x128xf32>, vector<8x128xf32> -> vector<8x128xf32>
    %189 = arith.addf %187, %188 : vector<8x128xf32>
    %190 = math.tanh %189 : vector<8x128xf32>
    %191 = arith.negf %189 : vector<8x128xf32>
    %192 = math.exp %191 : vector<8x128xf32>
    %cst_48 = arith.constant 1.000000e+00 : f32
    %193 = vector.broadcast %cst_48 : f32 to vector<8x128xf32>
    %194 = arith.addf %193, %192 : vector<8x128xf32>
    %195 = arith.divf %193, %194 : vector<8x128xf32>
    %196 = arith.select %5, %190, %195 : vector<8x128xi1>, vector<8x128xf32>
    %197 = vector.extract_strided_slice %196 {offsets = [0, 0], sizes = [8, 32], strides = [1, 1]} : vector<8x128xf32> to vector<8x32xf32>
    %198 = vector.extract_strided_slice %196 {offsets = [0, 32], sizes = [8, 32], strides = [1, 1]} : vector<8x128xf32> to vector<8x32xf32>
    %199 = vector.extract_strided_slice %196 {offsets = [0, 64], sizes = [8, 32], strides = [1, 1]} : vector<8x128xf32> to vector<8x32xf32>
    %200 = vector.extract_strided_slice %196 {offsets = [0, 96], sizes = [8, 32], strides = [1, 1]} : vector<8x128xf32> to vector<8x32xf32>
    %201 = arith.mulf %198, %179 : vector<8x32xf32>
    %202 = arith.mulf %197, %199 : vector<8x32xf32>
    %203 = arith.addf %201, %202 : vector<8x32xf32>
    %204 = math.tanh %203 : vector<8x32xf32>
    %205 = arith.mulf %200, %204 : vector<8x32xf32>
    %206 = arith.index_cast %185 : i32 to index
    %c0_49 = arith.constant 0 : index
    %207 = vector.load %arg10[%206, %c0_49] : memref<64x32xf32, #tpu.memory_space<vmem>>, vector<8x32xf32>
    tpu.vector_store %arg10[%206, %c0_49], %205 {strides = array<i32>} : memref<64x32xf32, #tpu.memory_space<vmem>>, vector<8x32xf32>,
    %c8_i32_50 = arith.constant 8 : i32
    %c0_51 = arith.constant 0 : index
    %c0_52 = arith.constant 0 : index
    %208 = vector.load %arg4[%c0_51, %c0_52] : memref<32x128xf32, #tpu.memory_space<vmem>>, vector<32x128xf32>
    %c0_53 = arith.constant 0 : index
    %c0_54 = arith.constant 0 : index
    %209 = vector.load %arg5[%c0_53, %c0_54] : memref<32x128xf32, #tpu.memory_space<vmem>>, vector<32x128xf32>
    %c0_55 = arith.constant 0 : index
    %c0_56 = arith.constant 0 : index
    %210 = vector.load %arg6[%c0_55, %c0_56] : memref<1x128xf32, #tpu.memory_space<vmem>>, vector<1x128xf32>
    %c0_57 = arith.constant 0 : index
    %c0_58 = arith.constant 0 : index
    %211 = vector.load %arg10[%c0_57, %c0_58] : memref<64x32xf32, #tpu.memory_space<vmem>>, vector<64x32xf32>
    %cst_59 = arith.constant dense<0.000000e+00> : vector<64x128xf32>
    %212 = tpu.matmul %211, %208, %cst_59 {dimension_numbers = #tpu.dot_dimension_numbers<[1], [0], [0], [1], [0, 0, 1, 1], [], []>} : vector<64x32xf32>, vector<32x128xf32>, vector<64x128xf32> -> vector<64x128xf32>
    %213 = vector.broadcast %210 : vector<1x128xf32> to vector<64x128xf32>
    %214 = arith.addf %212, %213 : vector<64x128xf32>
    %c0_60 = arith.constant 0 : index
    %c0_61 = arith.constant 0 : index
    %215 = vector.load %arg11[%c0_60, %c0_61] : memref<64x128xf32, #tpu.memory_space<vmem>>, vector<64x128xf32>
    tpu.vector_store %arg11[%c0_60, %c0_61], %214 {strides = array<i32>} : memref<64x128xf32, #tpu.memory_space<vmem>>, vector<64x128xf32>,
    %cst_62 = arith.constant 0.000000e+00 : f32
    %216 = vector.broadcast %cst_62 : f32 to vector<8x32xf32>
    %cst_63 = arith.constant 0.000000e+00 : f32
    %217 = vector.broadcast %cst_63 : f32 to vector<8x32xf32>
    %c0_i32_64 = arith.constant 0 : i32
    %c8_i32_65 = arith.constant 8 : i32
    %218 = arith.muli %c0_i32_64, %c8_i32_65 : i32
    %219 = tpu.assume_multiple %218, 8 : i32
    %220 = arith.index_cast %219 : i32 to index
    %c0_66 = arith.constant 0 : index
    %221 = vector.load %arg11[%220, %c0_66] : memref<64x128xf32, #tpu.memory_space<vmem>>, vector<8x128xf32>
    %cst_67 = arith.constant dense<0.000000e+00> : vector<8x128xf32>
    %222 = tpu.matmul %216, %209, %cst_67 {dimension_numbers = #tpu.dot_dimension_numbers<[1], [0], [0], [1], [0, 0, 1, 1], [], []>} : vector<8x32xf32>, vector<32x128xf32>, vector<8x128xf32> -> vector<8x128xf32>
    %223 = arith.addf %221, %222 : vector<8x128xf32>
    %224 = math.tanh %223 : vector<8x128xf32>
    %225 = arith.negf %223 : vector<8x128xf32>
    %226 = math.exp %225 : vector<8x128xf32>
    %cst_68 = arith.constant 1.000000e+00 : f32
    %227 = vector.broadcast %cst_68 : f32 to vector<8x128xf32>
    %228 = arith.addf %227, %226 : vector<8x128xf32>
    %229 = arith.divf %227, %228 : vector<8x128xf32>
    %230 = arith.select %5, %224, %229 : vector<8x128xi1>, vector<8x128xf32>
    %231 = vector.extract_strided_slice %230 {offsets = [0, 0], sizes = [8, 32], strides = [1, 1]} : vector<8x128xf32> to vector<8x32xf32>
    %232 = vector.extract_strided_slice %230 {offsets = [0, 32], sizes = [8, 32], strides = [1, 1]} : vector<8x128xf32> to vector<8x32xf32>
    %233 = vector.extract_strided_slice %230 {offsets = [0, 64], sizes = [8, 32], strides = [1, 1]} : vector<8x128xf32> to vector<8x32xf32>
    %234 = vector.extract_strided_slice %230 {offsets = [0, 96], sizes = [8, 32], strides = [1, 1]} : vector<8x128xf32> to vector<8x32xf32>
    %235 = arith.mulf %232, %217 : vector<8x32xf32>
    %236 = arith.mulf %231, %233 : vector<8x32xf32>
    %237 = arith.addf %235, %236 : vector<8x32xf32>
    %238 = math.tanh %237 : vector<8x32xf32>
    %239 = arith.mulf %234, %238 : vector<8x32xf32>
    %240 = arith.index_cast %219 : i32 to index
    %c0_69 = arith.constant 0 : index
    %241 = vector.load %arg10[%240, %c0_69] : memref<64x32xf32, #tpu.memory_space<vmem>>, vector<8x32xf32>
    tpu.vector_store %arg10[%240, %c0_69], %239 {strides = array<i32>} : memref<64x32xf32, #tpu.memory_space<vmem>>, vector<8x32xf32>,
    %c1_i32_70 = arith.constant 1 : i32
    %c8_i32_71 = arith.constant 8 : i32
    %242 = arith.muli %c1_i32_70, %c8_i32_71 : i32
    %243 = tpu.assume_multiple %242, 8 : i32
    %244 = arith.index_cast %243 : i32 to index
    %c0_72 = arith.constant 0 : index
    %245 = vector.load %arg11[%244, %c0_72] : memref<64x128xf32, #tpu.memory_space<vmem>>, vector<8x128xf32>
    %cst_73 = arith.constant dense<0.000000e+00> : vector<8x128xf32>
    %246 = tpu.matmul %239, %209, %cst_73 {dimension_numbers = #tpu.dot_dimension_numbers<[1], [0], [0], [1], [0, 0, 1, 1], [], []>} : vector<8x32xf32>, vector<32x128xf32>, vector<8x128xf32> -> vector<8x128xf32>
    %247 = arith.addf %245, %246 : vector<8x128xf32>
    %248 = math.tanh %247 : vector<8x128xf32>
    %249 = arith.negf %247 : vector<8x128xf32>
    %250 = math.exp %249 : vector<8x128xf32>
    %cst_74 = arith.constant 1.000000e+00 : f32
    %251 = vector.broadcast %cst_74 : f32 to vector<8x128xf32>
    %252 = arith.addf %251, %250 : vector<8x128xf32>
    %253 = arith.divf %251, %252 : vector<8x128xf32>
    %254 = arith.select %5, %248, %253 : vector<8x128xi1>, vector<8x128xf32>
    %255 = vector.extract_strided_slice %254 {offsets = [0, 0], sizes = [8, 32], strides = [1, 1]} : vector<8x128xf32> to vector<8x32xf32>
    %256 = vector.extract_strided_slice %254 {offsets = [0, 32], sizes = [8, 32], strides = [1, 1]} : vector<8x128xf32> to vector<8x32xf32>
    %257 = vector.extract_strided_slice %254 {offsets = [0, 64], sizes = [8, 32], strides = [1, 1]} : vector<8x128xf32> to vector<8x32xf32>
    %258 = vector.extract_strided_slice %254 {offsets = [0, 96], sizes = [8, 32], strides = [1, 1]} : vector<8x128xf32> to vector<8x32xf32>
    %259 = arith.mulf %256, %237 : vector<8x32xf32>
    %260 = arith.mulf %255, %257 : vector<8x32xf32>
    %261 = arith.addf %259, %260 : vector<8x32xf32>
    %262 = math.tanh %261 : vector<8x32xf32>
    %263 = arith.mulf %258, %262 : vector<8x32xf32>
    %264 = arith.index_cast %243 : i32 to index
    %c0_75 = arith.constant 0 : index
    %265 = vector.load %arg10[%264, %c0_75] : memref<64x32xf32, #tpu.memory_space<vmem>>, vector<8x32xf32>
    tpu.vector_store %arg10[%264, %c0_75], %263 {strides = array<i32>} : memref<64x32xf32, #tpu.memory_space<vmem>>, vector<8x32xf32>,
    %c2_i32_76 = arith.constant 2 : i32
    %c8_i32_77 = arith.constant 8 : i32
    %266 = arith.muli %c2_i32_76, %c8_i32_77 : i32
    %267 = tpu.assume_multiple %266, 8 : i32
    %268 = arith.index_cast %267 : i32 to index
    %c0_78 = arith.constant 0 : index
    %269 = vector.load %arg11[%268, %c0_78] : memref<64x128xf32, #tpu.memory_space<vmem>>, vector<8x128xf32>
    %cst_79 = arith.constant dense<0.000000e+00> : vector<8x128xf32>
    %270 = tpu.matmul %263, %209, %cst_79 {dimension_numbers = #tpu.dot_dimension_numbers<[1], [0], [0], [1], [0, 0, 1, 1], [], []>} : vector<8x32xf32>, vector<32x128xf32>, vector<8x128xf32> -> vector<8x128xf32>
    %271 = arith.addf %269, %270 : vector<8x128xf32>
    %272 = math.tanh %271 : vector<8x128xf32>
    %273 = arith.negf %271 : vector<8x128xf32>
    %274 = math.exp %273 : vector<8x128xf32>
    %cst_80 = arith.constant 1.000000e+00 : f32
    %275 = vector.broadcast %cst_80 : f32 to vector<8x128xf32>
    %276 = arith.addf %275, %274 : vector<8x128xf32>
    %277 = arith.divf %275, %276 : vector<8x128xf32>
    %278 = arith.select %5, %272, %277 : vector<8x128xi1>, vector<8x128xf32>
    %279 = vector.extract_strided_slice %278 {offsets = [0, 0], sizes = [8, 32], strides = [1, 1]} : vector<8x128xf32> to vector<8x32xf32>
    %280 = vector.extract_strided_slice %278 {offsets = [0, 32], sizes = [8, 32], strides = [1, 1]} : vector<8x128xf32> to vector<8x32xf32>
    %281 = vector.extract_strided_slice %278 {offsets = [0, 64], sizes = [8, 32], strides = [1, 1]} : vector<8x128xf32> to vector<8x32xf32>
    %282 = vector.extract_strided_slice %278 {offsets = [0, 96], sizes = [8, 32], strides = [1, 1]} : vector<8x128xf32> to vector<8x32xf32>
    %283 = arith.mulf %280, %261 : vector<8x32xf32>
    %284 = arith.mulf %279, %281 : vector<8x32xf32>
    %285 = arith.addf %283, %284 : vector<8x32xf32>
    %286 = math.tanh %285 : vector<8x32xf32>
    %287 = arith.mulf %282, %286 : vector<8x32xf32>
    %288 = arith.index_cast %267 : i32 to index
    %c0_81 = arith.constant 0 : index
    %289 = vector.load %arg10[%288, %c0_81] : memref<64x32xf32, #tpu.memory_space<vmem>>, vector<8x32xf32>
    tpu.vector_store %arg10[%288, %c0_81], %287 {strides = array<i32>} : memref<64x32xf32, #tpu.memory_space<vmem>>, vector<8x32xf32>,
    %c3_i32_82 = arith.constant 3 : i32
    %c8_i32_83 = arith.constant 8 : i32
    %290 = arith.muli %c3_i32_82, %c8_i32_83 : i32
    %291 = tpu.assume_multiple %290, 8 : i32
    %292 = arith.index_cast %291 : i32 to index
    %c0_84 = arith.constant 0 : index
    %293 = vector.load %arg11[%292, %c0_84] : memref<64x128xf32, #tpu.memory_space<vmem>>, vector<8x128xf32>
    %cst_85 = arith.constant dense<0.000000e+00> : vector<8x128xf32>
    %294 = tpu.matmul %287, %209, %cst_85 {dimension_numbers = #tpu.dot_dimension_numbers<[1], [0], [0], [1], [0, 0, 1, 1], [], []>} : vector<8x32xf32>, vector<32x128xf32>, vector<8x128xf32> -> vector<8x128xf32>
    %295 = arith.addf %293, %294 : vector<8x128xf32>
    %296 = math.tanh %295 : vector<8x128xf32>
    %297 = arith.negf %295 : vector<8x128xf32>
    %298 = math.exp %297 : vector<8x128xf32>
    %cst_86 = arith.constant 1.000000e+00 : f32
    %299 = vector.broadcast %cst_86 : f32 to vector<8x128xf32>
    %300 = arith.addf %299, %298 : vector<8x128xf32>
    %301 = arith.divf %299, %300 : vector<8x128xf32>
    %302 = arith.select %5, %296, %301 : vector<8x128xi1>, vector<8x128xf32>
    %303 = vector.extract_strided_slice %302 {offsets = [0, 0], sizes = [8, 32], strides = [1, 1]} : vector<8x128xf32> to vector<8x32xf32>
    %304 = vector.extract_strided_slice %302 {offsets = [0, 32], sizes = [8, 32], strides = [1, 1]} : vector<8x128xf32> to vector<8x32xf32>
    %305 = vector.extract_strided_slice %302 {offsets = [0, 64], sizes = [8, 32], strides = [1, 1]} : vector<8x128xf32> to vector<8x32xf32>
    %306 = vector.extract_strided_slice %302 {offsets = [0, 96], sizes = [8, 32], strides = [1, 1]} : vector<8x128xf32> to vector<8x32xf32>
    %307 = arith.mulf %304, %285 : vector<8x32xf32>
    %308 = arith.mulf %303, %305 : vector<8x32xf32>
    %309 = arith.addf %307, %308 : vector<8x32xf32>
    %310 = math.tanh %309 : vector<8x32xf32>
    %311 = arith.mulf %306, %310 : vector<8x32xf32>
    %312 = arith.index_cast %291 : i32 to index
    %c0_87 = arith.constant 0 : index
    %313 = vector.load %arg10[%312, %c0_87] : memref<64x32xf32, #tpu.memory_space<vmem>>, vector<8x32xf32>
    tpu.vector_store %arg10[%312, %c0_87], %311 {strides = array<i32>} : memref<64x32xf32, #tpu.memory_space<vmem>>, vector<8x32xf32>,
    %c4_i32_88 = arith.constant 4 : i32
    %c8_i32_89 = arith.constant 8 : i32
    %314 = arith.muli %c4_i32_88, %c8_i32_89 : i32
    %315 = tpu.assume_multiple %314, 8 : i32
    %316 = arith.index_cast %315 : i32 to index
    %c0_90 = arith.constant 0 : index
    %317 = vector.load %arg11[%316, %c0_90] : memref<64x128xf32, #tpu.memory_space<vmem>>, vector<8x128xf32>
    %cst_91 = arith.constant dense<0.000000e+00> : vector<8x128xf32>
    %318 = tpu.matmul %311, %209, %cst_91 {dimension_numbers = #tpu.dot_dimension_numbers<[1], [0], [0], [1], [0, 0, 1, 1], [], []>} : vector<8x32xf32>, vector<32x128xf32>, vector<8x128xf32> -> vector<8x128xf32>
    %319 = arith.addf %317, %318 : vector<8x128xf32>
    %320 = math.tanh %319 : vector<8x128xf32>
    %321 = arith.negf %319 : vector<8x128xf32>
    %322 = math.exp %321 : vector<8x128xf32>
    %cst_92 = arith.constant 1.000000e+00 : f32
    %323 = vector.broadcast %cst_92 : f32 to vector<8x128xf32>
    %324 = arith.addf %323, %322 : vector<8x128xf32>
    %325 = arith.divf %323, %324 : vector<8x128xf32>
    %326 = arith.select %5, %320, %325 : vector<8x128xi1>, vector<8x128xf32>
    %327 = vector.extract_strided_slice %326 {offsets = [0, 0], sizes = [8, 32], strides = [1, 1]} : vector<8x128xf32> to vector<8x32xf32>
    %328 = vector.extract_strided_slice %326 {offsets = [0, 32], sizes = [8, 32], strides = [1, 1]} : vector<8x128xf32> to vector<8x32xf32>
    %329 = vector.extract_strided_slice %326 {offsets = [0, 64], sizes = [8, 32], strides = [1, 1]} : vector<8x128xf32> to vector<8x32xf32>
    %330 = vector.extract_strided_slice %326 {offsets = [0, 96], sizes = [8, 32], strides = [1, 1]} : vector<8x128xf32> to vector<8x32xf32>
    %331 = arith.mulf %328, %309 : vector<8x32xf32>
    %332 = arith.mulf %327, %329 : vector<8x32xf32>
    %333 = arith.addf %331, %332 : vector<8x32xf32>
    %334 = math.tanh %333 : vector<8x32xf32>
    %335 = arith.mulf %330, %334 : vector<8x32xf32>
    %336 = arith.index_cast %315 : i32 to index
    %c0_93 = arith.constant 0 : index
    %337 = vector.load %arg10[%336, %c0_93] : memref<64x32xf32, #tpu.memory_space<vmem>>, vector<8x32xf32>
    tpu.vector_store %arg10[%336, %c0_93], %335 {strides = array<i32>} : memref<64x32xf32, #tpu.memory_space<vmem>>, vector<8x32xf32>,
    %c5_i32_94 = arith.constant 5 : i32
    %c8_i32_95 = arith.constant 8 : i32
    %338 = arith.muli %c5_i32_94, %c8_i32_95 : i32
    %339 = tpu.assume_multiple %338, 8 : i32
    %340 = arith.index_cast %339 : i32 to index
    %c0_96 = arith.constant 0 : index
    %341 = vector.load %arg11[%340, %c0_96] : memref<64x128xf32, #tpu.memory_space<vmem>>, vector<8x128xf32>
    %cst_97 = arith.constant dense<0.000000e+00> : vector<8x128xf32>
    %342 = tpu.matmul %335, %209, %cst_97 {dimension_numbers = #tpu.dot_dimension_numbers<[1], [0], [0], [1], [0, 0, 1, 1], [], []>} : vector<8x32xf32>, vector<32x128xf32>, vector<8x128xf32> -> vector<8x128xf32>
    %343 = arith.addf %341, %342 : vector<8x128xf32>
    %344 = math.tanh %343 : vector<8x128xf32>
    %345 = arith.negf %343 : vector<8x128xf32>
    %346 = math.exp %345 : vector<8x128xf32>
    %cst_98 = arith.constant 1.000000e+00 : f32
    %347 = vector.broadcast %cst_98 : f32 to vector<8x128xf32>
    %348 = arith.addf %347, %346 : vector<8x128xf32>
    %349 = arith.divf %347, %348 : vector<8x128xf32>
    %350 = arith.select %5, %344, %349 : vector<8x128xi1>, vector<8x128xf32>
    %351 = vector.extract_strided_slice %350 {offsets = [0, 0], sizes = [8, 32], strides = [1, 1]} : vector<8x128xf32> to vector<8x32xf32>
    %352 = vector.extract_strided_slice %350 {offsets = [0, 32], sizes = [8, 32], strides = [1, 1]} : vector<8x128xf32> to vector<8x32xf32>
    %353 = vector.extract_strided_slice %350 {offsets = [0, 64], sizes = [8, 32], strides = [1, 1]} : vector<8x128xf32> to vector<8x32xf32>
    %354 = vector.extract_strided_slice %350 {offsets = [0, 96], sizes = [8, 32], strides = [1, 1]} : vector<8x128xf32> to vector<8x32xf32>
    %355 = arith.mulf %352, %333 : vector<8x32xf32>
    %356 = arith.mulf %351, %353 : vector<8x32xf32>
    %357 = arith.addf %355, %356 : vector<8x32xf32>
    %358 = math.tanh %357 : vector<8x32xf32>
    %359 = arith.mulf %354, %358 : vector<8x32xf32>
    %360 = arith.index_cast %339 : i32 to index
    %c0_99 = arith.constant 0 : index
    %361 = vector.load %arg10[%360, %c0_99] : memref<64x32xf32, #tpu.memory_space<vmem>>, vector<8x32xf32>
    tpu.vector_store %arg10[%360, %c0_99], %359 {strides = array<i32>} : memref<64x32xf32, #tpu.memory_space<vmem>>, vector<8x32xf32>,
    %c6_i32_100 = arith.constant 6 : i32
    %c8_i32_101 = arith.constant 8 : i32
    %362 = arith.muli %c6_i32_100, %c8_i32_101 : i32
    %363 = tpu.assume_multiple %362, 8 : i32
    %364 = arith.index_cast %363 : i32 to index
    %c0_102 = arith.constant 0 : index
    %365 = vector.load %arg11[%364, %c0_102] : memref<64x128xf32, #tpu.memory_space<vmem>>, vector<8x128xf32>
    %cst_103 = arith.constant dense<0.000000e+00> : vector<8x128xf32>
    %366 = tpu.matmul %359, %209, %cst_103 {dimension_numbers = #tpu.dot_dimension_numbers<[1], [0], [0], [1], [0, 0, 1, 1], [], []>} : vector<8x32xf32>, vector<32x128xf32>, vector<8x128xf32> -> vector<8x128xf32>
    %367 = arith.addf %365, %366 : vector<8x128xf32>
    %368 = math.tanh %367 : vector<8x128xf32>
    %369 = arith.negf %367 : vector<8x128xf32>
    %370 = math.exp %369 : vector<8x128xf32>
    %cst_104 = arith.constant 1.000000e+00 : f32
    %371 = vector.broadcast %cst_104 : f32 to vector<8x128xf32>
    %372 = arith.addf %371, %370 : vector<8x128xf32>
    %373 = arith.divf %371, %372 : vector<8x128xf32>
    %374 = arith.select %5, %368, %373 : vector<8x128xi1>, vector<8x128xf32>
    %375 = vector.extract_strided_slice %374 {offsets = [0, 0], sizes = [8, 32], strides = [1, 1]} : vector<8x128xf32> to vector<8x32xf32>
    %376 = vector.extract_strided_slice %374 {offsets = [0, 32], sizes = [8, 32], strides = [1, 1]} : vector<8x128xf32> to vector<8x32xf32>
    %377 = vector.extract_strided_slice %374 {offsets = [0, 64], sizes = [8, 32], strides = [1, 1]} : vector<8x128xf32> to vector<8x32xf32>
    %378 = vector.extract_strided_slice %374 {offsets = [0, 96], sizes = [8, 32], strides = [1, 1]} : vector<8x128xf32> to vector<8x32xf32>
    %379 = arith.mulf %376, %357 : vector<8x32xf32>
    %380 = arith.mulf %375, %377 : vector<8x32xf32>
    %381 = arith.addf %379, %380 : vector<8x32xf32>
    %382 = math.tanh %381 : vector<8x32xf32>
    %383 = arith.mulf %378, %382 : vector<8x32xf32>
    %384 = arith.index_cast %363 : i32 to index
    %c0_105 = arith.constant 0 : index
    %385 = vector.load %arg10[%384, %c0_105] : memref<64x32xf32, #tpu.memory_space<vmem>>, vector<8x32xf32>
    tpu.vector_store %arg10[%384, %c0_105], %383 {strides = array<i32>} : memref<64x32xf32, #tpu.memory_space<vmem>>, vector<8x32xf32>,
    %c7_i32_106 = arith.constant 7 : i32
    %c8_i32_107 = arith.constant 8 : i32
    %386 = arith.muli %c7_i32_106, %c8_i32_107 : i32
    %387 = tpu.assume_multiple %386, 8 : i32
    %388 = arith.index_cast %387 : i32 to index
    %c0_108 = arith.constant 0 : index
    %389 = vector.load %arg11[%388, %c0_108] : memref<64x128xf32, #tpu.memory_space<vmem>>, vector<8x128xf32>
    %cst_109 = arith.constant dense<0.000000e+00> : vector<8x128xf32>
    %390 = tpu.matmul %383, %209, %cst_109 {dimension_numbers = #tpu.dot_dimension_numbers<[1], [0], [0], [1], [0, 0, 1, 1], [], []>} : vector<8x32xf32>, vector<32x128xf32>, vector<8x128xf32> -> vector<8x128xf32>
    %391 = arith.addf %389, %390 : vector<8x128xf32>
    %392 = math.tanh %391 : vector<8x128xf32>
    %393 = arith.negf %391 : vector<8x128xf32>
    %394 = math.exp %393 : vector<8x128xf32>
    %cst_110 = arith.constant 1.000000e+00 : f32
    %395 = vector.broadcast %cst_110 : f32 to vector<8x128xf32>
    %396 = arith.addf %395, %394 : vector<8x128xf32>
    %397 = arith.divf %395, %396 : vector<8x128xf32>
    %398 = arith.select %5, %392, %397 : vector<8x128xi1>, vector<8x128xf32>
    %399 = vector.extract_strided_slice %398 {offsets = [0, 0], sizes = [8, 32], strides = [1, 1]} : vector<8x128xf32> to vector<8x32xf32>
    %400 = vector.extract_strided_slice %398 {offsets = [0, 32], sizes = [8, 32], strides = [1, 1]} : vector<8x128xf32> to vector<8x32xf32>
    %401 = vector.extract_strided_slice %398 {offsets = [0, 64], sizes = [8, 32], strides = [1, 1]} : vector<8x128xf32> to vector<8x32xf32>
    %402 = vector.extract_strided_slice %398 {offsets = [0, 96], sizes = [8, 32], strides = [1, 1]} : vector<8x128xf32> to vector<8x32xf32>
    %403 = arith.mulf %400, %381 : vector<8x32xf32>
    %404 = arith.mulf %399, %401 : vector<8x32xf32>
    %405 = arith.addf %403, %404 : vector<8x32xf32>
    %406 = math.tanh %405 : vector<8x32xf32>
    %407 = arith.mulf %402, %406 : vector<8x32xf32>
    %408 = arith.index_cast %387 : i32 to index
    %c0_111 = arith.constant 0 : index
    %409 = vector.load %arg10[%408, %c0_111] : memref<64x32xf32, #tpu.memory_space<vmem>>, vector<8x32xf32>
    tpu.vector_store %arg10[%408, %c0_111], %407 {strides = array<i32>} : memref<64x32xf32, #tpu.memory_space<vmem>>, vector<8x32xf32>,
    %c8_i32_112 = arith.constant 8 : i32
    %c0_113 = arith.constant 0 : index
    %c0_114 = arith.constant 0 : index
    %410 = vector.load %arg7[%c0_113, %c0_114] : memref<32x128xf32, #tpu.memory_space<vmem>>, vector<32x128xf32>
    %c0_115 = arith.constant 0 : index
    %c0_116 = arith.constant 0 : index
    %411 = vector.load %arg8[%c0_115, %c0_116] : memref<1x128xf32, #tpu.memory_space<vmem>>, vector<1x128xf32>
    %c0_117 = arith.constant 0 : index
    %c0_118 = arith.constant 0 : index
    %412 = vector.load %arg10[%c0_117, %c0_118] : memref<64x32xf32, #tpu.memory_space<vmem>>, vector<64x32xf32>
    %cst_119 = arith.constant dense<0.000000e+00> : vector<64x128xf32>
    %413 = tpu.matmul %412, %410, %cst_119 {dimension_numbers = #tpu.dot_dimension_numbers<[1], [0], [0], [1], [0, 0, 1, 1], [], []>} : vector<64x32xf32>, vector<32x128xf32>, vector<64x128xf32> -> vector<64x128xf32>
    %414 = vector.broadcast %411 : vector<1x128xf32> to vector<64x128xf32>
    %415 = arith.addf %413, %414 : vector<64x128xf32>
    %c0_120 = arith.constant 0 : index
    %c0_121 = arith.constant 0 : index
    %416 = vector.load %arg9[%c0_120, %c0_121] : memref<64x128xf32, #tpu.memory_space<vmem>>, vector<64x128xf32>
    tpu.vector_store %arg9[%c0_120, %c0_121], %415 {strides = array<i32>} : memref<64x128xf32, #tpu.memory_space<vmem>>, vector<64x128xf32>,
    return
  }
}

</mosaic_0001>

<bundles_post_ra>
// kernel: tpu_custom_call.1
= control target key start
LH: loop header
LB: loop body
LE: loop exit
PB: predicated region body
PF: predicated region fallthrough
CT: control target
= control target key end

     0   :  { %14 = vsyncpa [#allocation5], 0  ;;  %s2184_s0 = inlined_call_operand.vmem [shape: f32[64,16], index: 0, kind: input, shape index: {}]   ;;  %s2185_s1 = inlined_call_operand.vmem [shape: f32[16,128], index: 1, kind: input, shape index: {}]   ;;  %s2186_s2 = inlined_call_operand.vmem [shape: f32[32,128], index: 2, kind: input, shape index: {}]   ;;  %s2187_s3 = inlined_call_operand.vmem [shape: f32[1,128], index: 3, kind: input, shape index: {}]   ;;  %s2188_s4 = inlined_call_operand.vmem [shape: f32[32,128], index: 4, kind: input, shape index: {}]   ;;  %s2189_s5 = inlined_call_operand.hbm [shape: f32[32,128], index: 5, kind: input, shape index: {}]   ;;  %s2190_s6 = inlined_call_operand.vmem [shape: f32[1,128], index: 6, kind: input, shape index: {}]   ;;  %s2191_s7 = inlined_call_operand.hbm [shape: f32[32,128], index: 7, kind: input, shape index: {}]   ;;  %s2192_s8 = inlined_call_operand.vmem [shape: f32[1,128], index: 8, kind: input, shape index: {}]   ;;  %s2193_s9 = inlined_call_operand.hbm [shape: f32[64,128], index: 9, kind: output, shape index: {}]  }
   0x1   :  { %15 = vsyncpa [#allocation8], 0 }
   0x2   :  { %16 = vsyncpa [#allocation6], 0  ;;  %s31_s11 = sshll.u32 %s2189_s5, 4  ;;  %s1729_s12 = smov [#allocation4]   ;;  %s32_s11 = int_to_ptr.hbm [resolvable:$true] %s31_s11 }
   0x3   :  { %s33_s13 = sshll.u32 %s1729_s12, 4  ;;  %s46_s16 = sshll.u32 %s2191_s7, 4  ;;  %s34_s13 = int_to_ptr.vmem [resolvable:$true] %s33_s13  ;;  %s47_s16 = int_to_ptr.hbm [resolvable:$true] %s46_s16 }
   0x4   :  { %s1730_s17 = smov 128   ;;  %s1731_s18 = smov 8  }
   0x5   :  { %39 = dma.hbm_to_vmem [thread:$0]  %s32_s11, 512, %s34_s13, [#allocation5], %s1730_s17, %s1730_s17, %s1731_s18  }
   0x6   :  { %s1732_s19 = smov [#allocation7]  }
   0x7   :  { %s48_s20 = sshll.u32 %s1732_s19, 4  ;;  %s49_s20 = int_to_ptr.vmem [resolvable:$true] %s48_s20 }
   0x8   :  { %54 = dma.hbm_to_vmem [thread:$0]  %s47_s16, 512, %s49_s20, [#allocation8], %s1730_s17, %s1730_s17, %s1731_s18  }
   0x9   :  { %1723 = dma.done.wait [#allocation5], 512  }
   0xa   :  { %1724 = vsyncadd [#allocation5], 4294966784 }
   0xb   :  { %1725 = dma.done.wait [#allocation8], 512  }
   0xc   :  { %1726 = vsyncadd [#allocation8], 4294966784  ;;  %v1802_v0 = vld [vmem:[%s2186_s2 + $0x18] sm:$0xff]  ;;  %v71_v1 = vld [vmem:[%s2185_s1 + $0x8] sm:$0xff]  ;;  %vm88_vm0 = vcmask 130048   ;;  %v1733_v7 = vmov 0.0   ;;  %v65_v16 = vlaneseq }
   0xd   :  { %v1810_v2 = vld [vmem:[%s2186_s2 + $0x10] sm:$0xff]  ;;  %179 = vmatpush.msra.mxu1 %v1802_v0  ;;  %127 = vmatpush.msra.mxu0 %v71_v1  ;;  %v70_v3 = vld [vmem:[%s2185_s1] sm:$0xff]  ;;  %v1822_v5 = vld [vmem:[%s2186_s2 + $0x8] sm:$0xff]  ;;  %s1735_s12 = smov 32   ;;  %vm163_vm8 = vcmask 261120   ;;  %s1436_s19 = sshll.u32 %s2193_s9, 4  ;;  %s1437_s19 = int_to_ptr.hbm [resolvable:$true] %s1436_s19 }
   0xe   :  { %v77_v4 = vld [vmem:[%s2184_s0] sm:$0xff]  ;;  %247 = vmatpush.msra.mxu2 %v1802_v0  ;;  %316 = vmatpush.msra.mxu3 %v1802_v0  ;;  %v66_v18 = vand.u32 127, %v65_v16  ;;  %v78_v39 = vld [vmem:[%s2184_s0 + $0x8] sm:$0xff] }
   0xf   :  { %180 = vmatpush.msra.mxu1 %v1810_v2  ;;  %128 = vmatpush.msra.mxu0 %v70_v3  ;;  %v1831_v6 = vld [vmem:[%s2186_s2] sm:$0xff] }
  0x10   :  { %1450 = vmatmul.msk.f32.vlgmr.msra.gmra.mxu0 %vm88_vm0, %v77_v4  ;;  %248 = vmatpush.msra.mxu2 %v1810_v2  ;;  %v1861_v8 = vld [vmem:[%s2187_s3] ss:$0 sm:$0xff]  ;;  %vm67_vm1 = vcmp.ge.s32.totalorder %v66_v18, 64  ;;  %vm68_vm2 = vcmp.lt.s32.totalorder %v66_v18, 96  ;;  %s1734_s3 = smov 64   ;;  %v79_v4 = vld [vmem:[%s2184_s0 + $0x10] sm:$0xff] }
  0x11   :  { %181 = vmatpush.msra.mxu1 %v1822_v5  ;;  %317 = vmatpush.msra.mxu3 %v1810_v2  ;;  %vm1864_vm4 = vmand %vm67_vm1, %vm68_vm2 }
  0x12   :  { %249 = vmatpush.msra.mxu2 %v1822_v5 }
  0x13   :  { %182 = vmatpush.msra.mxu1 %v1831_v6  ;;  %318 = vmatpush.msra.mxu3 %v1822_v5 }
  0x14   :  { %183 = vmatmul.f32.vlgmr.msra.gmra.mxu1 %v1733_v7  ;;  %250 = vmatpush.msra.mxu2 %v1831_v6 }
  0x15   :  { %319 = vmatpush.msra.mxu3 %v1831_v6  ;;  %385 = vmatpush.msrb.mxu1 %v1802_v0 }
  0x16   :  { %454 = vmatpush.msrb.mxu2 %v1802_v0 }
  0x17   :  { %523 = vmatpush.msrb.mxu3 %v1802_v0  ;;  %386 = vmatpush.msrb.mxu1 %v1810_v2 }
  0x18   :  { %455 = vmatpush.msrb.mxu2 %v1810_v2  ;;  %1451 = vmatmul.msk.f32.gmra.mxu0 %vm88_vm0, %v78_v39 }
  0x19   :  { %524 = vmatpush.msrb.mxu3 %v1810_v2  ;;  %387 = vmatpush.msrb.mxu1 %v1822_v5 }
  0x1a   :  { %456 = vmatpush.msrb.mxu2 %v1822_v5 }
  0x1b   :  { %525 = vmatpush.msrb.mxu3 %v1822_v5  ;;  %388 = vmatpush.msrb.mxu1 %v1831_v6 }
  0x1c   :  { %457 = vmatpush.msrb.mxu2 %v1831_v6 }
  0x1d   :  { %526 = vmatpush.msrb.mxu3 %v1831_v6  ;;  %592 = vmatpush.msra.mxu1 %v1802_v0 }
  0x1f   :  { %593 = vmatpush.msra.mxu1 %v1810_v2 }
  0x20   :  { %1452 = vmatmul.msk.f32.gmra.mxu0 %vm88_vm0, %v79_v4 }
  0x21   :  { %594 = vmatpush.msra.mxu1 %v1822_v5 }
  0x23   :  { %595 = vmatpush.msra.mxu1 %v1831_v6 }
  0x8d   :  { %v130_v9 = vpop.f32.mrf.mxu0 }
  0x8e   :  { %v131_v10 = vadd.f32 %v1861_v8, %v130_v9 }
  0x91   :  { %v184_v11 = vpop.f32.mrf.mxu1 }
  0x92   :  { %v187_v12 = vadd.f32 %v184_v11, %v131_v10 }
  0x94   :  { %v1458_v13 = vmul.f32 -1.442695, %v187_v12 }
  0x95   :  { %v133_v41 = vpop.f32.mrf.mxu0 }
  0x96   :  { %1523 = vpow2.f32 %v1458_v13  ;;  %v134_v42 = vadd.f32 %v1861_v8, %v133_v41 }
  0x9c   :  { %v1524_v14 = vpop.eup %1523 }
  0x9d   :  { %v192_v15 = vadd.f32 1.0, %v1524_v14 }
  0x9f   :  { %1525 = vrcp.f32 %v192_v15  ;;  %v204_v21 = vand.u32 2147483648, %v192_v15  ;;  %v202_v23 = vand.u32 2147483647, %v192_v15  ;;  %vm198_vm5 = vweird.f32 %v192_v15 }
  0xa0   :  { %1527 = vtanh.f32 %v187_v12 }
  0xa1   :  { %v205_v26 = vor.u32 1.1754944e-38, %v204_v21  ;;  %vm203_vm7 = vcmp.eq.f32.partialorder %v202_v23, 8.507059e+37 }
  0xa5   :  { %v1526_v17 = vpop.eup %1525 }
  0xa6   :  { %v194_v19 = vmul.f32 %v1526_v17, %v192_v15  ;;  %vm199_vm3 = vweird.f32 %v1526_v17  ;;  %v1528_v28 = vpop.eup %1527 }
  0xa7   :  { %vm200_vm6 = vmor %vm198_vm5, %vm199_vm3 }
  0xa8   :  { %v195_v20 = vsub.f32 1.0, %v194_v19 }
  0xaa   :  { %v196_v22 = vmul.f32 %v1526_v17, %v195_v20 }
  0xac   :  { %v197_v25 = vadd.f32 %v1526_v17, %v196_v22 }
  0xae   :  { %v201_v27 = vsel %vm200_vm6, %v1526_v17, %v197_v25 }
  0xaf   :  { %v206_v29 = vsel %vm203_vm7, %v205_v26, %v201_v27 }
  0xb0   :  { %v208_v30 = vsel %vm1864_vm4, %v1528_v28, %v206_v29 }
  0xb1   :  { %211 = vrot.lane.b32.xlu0 %v208_v30, %s1734_s3  ;;  %v209_v33 = vmul.f32 0.0, %v208_v30 }
 0x123   :  { %v212_v31 = vpop.permute.xlu0 %211 }
 0x124   :  { %v214_v32 = vmul.f32 %v212_v31, %v208_v30 }
 0x126   :  { %216 = vrot.lane.b32.xlu0 %v214_v32, %s1735_s12 }
 0x198   :  { %v217_v34 = vpop.permute.xlu0 %216 }
 0x199   :  { %v219_v35 = vadd.f32 %v217_v34, %v209_v33  ;;  %v80_v34 = vld [vmem:[%s2184_s0 + $0x18] sm:$0xff] }
 0x19a   :  { %1453 = vmatmul.msk.f32.gmra.mxu0 %vm88_vm0, %v80_v34  ;;  %v716_v34 = vld [vmem:[%s2188_s4 + $0x10] sm:$0xff] }
 0x19b   :  { %1529 = vtanh.f32 %v219_v35 }
 0x1a1   :  { %v1530_v36 = vpop.eup %1529 }
 0x1a2   :  { %222 = vrot.lane.b32.xlu1 %v1530_v36, %s1734_s3 }
 0x214   :  { %v223_v37 = vpop.permute.xlu1 %222 }
 0x215   :  { %v225_v38 = vmul.f32 %v223_v37, %v208_v30 }
 0x217   :  { %227 = vrot.lane.b32.xlu1 %v225_v38, %s1735_s12 }
 0x289   :  { %v228_v40 = vpop.permute.xlu1 %227 }
 0x28a   :  { %230 = vst.msk [vmem:[#allocation2] sm:$0xff] %vm163_vm8, %v228_v40  ;;  %1459 = vmatmul.msk.f32.vlgmr.msra.gmra.mxu2 %vm163_vm8, %v228_v40 }
 0x28b   :  { %661 = vmatpush.msra.mxu2 %v1802_v0 }
 0x28d   :  { %662 = vmatpush.msra.mxu2 %v1810_v2 }
 0x28f   :  { %663 = vmatpush.msra.mxu2 %v1822_v5 }
 0x291   :  { %664 = vmatpush.msra.mxu2 %v1831_v6  ;;  %v136_v6 = vpop.f32.mrf.mxu0 }
 0x292   :  { %v137_v9 = vadd.f32 %v1861_v8, %v136_v6 }
 0x299   :  { %v139_v38 = vpop.f32.mrf.mxu0 }
 0x29a   :  { %v140_v39 = vadd.f32 %v1861_v8, %v139_v38 }
 0x30d   :  { %v252_v43 = vpop.f32.mrf.mxu2 }
 0x30e   :  { %v255_v44 = vadd.f32 %v252_v43, %v134_v42 }
 0x310   :  { %v1460_v45 = vmul.f32 -1.442695, %v255_v44 }
 0x312   :  { %1531 = vpow2.f32 %v1460_v45 }
 0x318   :  { %v1532_v46 = vpop.eup %1531 }
 0x319   :  { %v260_v47 = vadd.f32 1.0, %v1532_v46 }
 0x31b   :  { %1533 = vrcp.f32 %v260_v47  ;;  %v272_v51 = vand.u32 2147483648, %v260_v47  ;;  %v270_v53 = vand.u32 2147483647, %v260_v47  ;;  %vm266_vm10 = vweird.f32 %v260_v47 }
 0x31c   :  { %1535 = vtanh.f32 %v255_v44 }
 0x31d   :  { %v273_v55 = vor.u32 1.1754944e-38, %v272_v51  ;;  %vm271_vm12 = vcmp.eq.f32.partialorder %v270_v53, 8.507059e+37 }
 0x321   :  { %v1534_v48 = vpop.eup %1533 }
 0x322   :  { %v262_v49 = vmul.f32 %v1534_v48, %v260_v47  ;;  %vm267_vm9 = vweird.f32 %v1534_v48  ;;  %v1536_v57 = vpop.eup %1535 }
 0x323   :  { %vm268_vm11 = vmor %vm266_vm10, %vm267_vm9 }
 0x324   :  { %v263_v50 = vsub.f32 1.0, %v262_v49 }
 0x326   :  { %v264_v52 = vmul.f32 %v1534_v48, %v263_v50 }
 0x328   :  { %v265_v54 = vadd.f32 %v1534_v48, %v264_v52 }
 0x32a   :  { %v269_v56 = vsel %vm268_vm11, %v1534_v48, %v265_v54 }
 0x32b   :  { %v274_v58 = vsel %vm271_vm12, %v273_v55, %v269_v56 }
 0x32c   :  { %v276_v59 = vsel %vm1864_vm4, %v1536_v57, %v274_v58 }
 0x32d   :  { %279 = vrot.lane.b32.xlu2 %v276_v59, %s1734_s3  ;;  %v277_v62 = vmul.f32 %v276_v59, %v219_v35 }
 0x387   :  { %v280_v60 = vpop.permute.xlu2 %279 }
 0x388   :  { %v282_v61 = vmul.f32 %v280_v60, %v276_v59 }
 0x38a   :  { %284 = vrot.lane.b32.xlu2 %v282_v61, %s1735_s12 }
 0x3e4   :  { %v285_v63 = vpop.permute.xlu2 %284 }
 0x3e5   :  { %v287_v0 = vadd.f32 %v285_v63, %v277_v62 }
 0x3e7   :  { %1537 = vtanh.f32 %v287_v0 }
 0x3ed   :  { %v1538_v1 = vpop.eup %1537 }
 0x3ee   :  { %290 = vrot.lane.b32.xlu0 %v1538_v1, %s1734_s3  ;;  %v81_v1 = vld [vmem:[%s2184_s0 + $0x20] sm:$0xff] }
 0x3ef   :  { %1454 = vmatmul.msk.f32.gmra.mxu0 %vm88_vm0, %v81_v1 }
 0x460   :  { %v291_v2 = vpop.permute.xlu0 %290 }
 0x461   :  { %v293_v3 = vmul.f32 %v291_v2, %v276_v59 }
 0x463   :  { %295 = vrot.lane.b32.xlu1 %v293_v3, %s1735_s12 }
 0x46c   :  { %v142_v3 = vpop.f32.mrf.mxu0 }
 0x46d   :  { %v143_v4 = vadd.f32 %v1861_v8, %v142_v3 }
 0x4d5   :  { %v296_v5 = vpop.permute.xlu1 %295 }
 0x4d6   :  { %299 = vst.msk [vmem:[#allocation2 + $0x8] sm:$0xff] %vm163_vm8, %v296_v5  ;;  %1461 = vmatmul.msk.f32.vlgmr.msra.gmra.mxu3 %vm163_vm8, %v296_v5 }
 0x559   :  { %v321_v10 = vpop.f32.mrf.mxu3 }
 0x55a   :  { %v324_v11 = vadd.f32 %v321_v10, %v137_v9 }
 0x55c   :  { %v1462_v12 = vmul.f32 -1.442695, %v324_v11 }
 0x55e   :  { %1539 = vpow2.f32 %v1462_v12 }
 0x564   :  { %v1540_v13 = vpop.eup %1539 }
 0x565   :  { %v329_v14 = vadd.f32 1.0, %v1540_v13 }
 0x567   :  { %1541 = vrcp.f32 %v329_v14  ;;  %v341_v18 = vand.u32 2147483648, %v329_v14  ;;  %v339_v20 = vand.u32 2147483647, %v329_v14  ;;  %vm335_vm14 = vweird.f32 %v329_v14 }
 0x568   :  { %1543 = vtanh.f32 %v324_v11 }
 0x569   :  { %v342_v22 = vor.u32 1.1754944e-38, %v341_v18  ;;  %vm340_vm1 = vcmp.eq.f32.partialorder %v339_v20, 8.507059e+37 }
 0x56d   :  { %v1542_v15 = vpop.eup %1541 }
 0x56e   :  { %v331_v16 = vmul.f32 %v1542_v15, %v329_v14  ;;  %vm336_vm13 = vweird.f32 %v1542_v15  ;;  %v1544_v25 = vpop.eup %1543 }
 0x56f   :  { %vm337_vm15 = vmor %vm335_vm14, %vm336_vm13 }
 0x570   :  { %v332_v17 = vsub.f32 1.0, %v331_v16 }
 0x572   :  { %v333_v19 = vmul.f32 %v1542_v15, %v332_v17 }
 0x574   :  { %v334_v21 = vadd.f32 %v1542_v15, %v333_v19 }
 0x576   :  { %v338_v23 = vsel %vm337_vm15, %v1542_v15, %v334_v21 }
 0x577   :  { %v343_v26 = vsel %vm340_vm1, %v342_v22, %v338_v23 }
 0x578   :  { %v345_v27 = vsel %vm1864_vm4, %v1544_v25, %v343_v26 }
 0x579   :  { %348 = vrot.lane.b32.xlu2 %v345_v27, %s1734_s3  ;;  %v346_v30 = vmul.f32 %v345_v27, %v287_v0 }
 0x5d3   :  { %v349_v28 = vpop.permute.xlu2 %348 }
 0x5d4   :  { %v351_v29 = vmul.f32 %v349_v28, %v345_v27 }
 0x5d6   :  { %353 = vrot.lane.b32.xlu0 %v351_v29, %s1735_s12 }
 0x648   :  { %v354_v31 = vpop.permute.xlu0 %353 }
 0x649   :  { %v356_v32 = vadd.f32 %v354_v31, %v346_v30 }
 0x64b   :  { %1545 = vtanh.f32 %v356_v32 }
 0x651   :  { %v1546_v33 = vpop.eup %1545 }
 0x652   :  { %359 = vrot.lane.b32.xlu1 %v1546_v33, %s1734_s3  ;;  %v717_v33 = vld [vmem:[%s2188_s4 + $0x18] sm:$0xff] }
 0x653   :  { %770 = vmatpush.msra.mxu3 %v717_v33 }
 0x655   :  { %771 = vmatpush.msra.mxu3 %v716_v34 }
 0x6c4   :  { %v360_v35 = vpop.permute.xlu1 %359 }
 0x6c5   :  { %v362_v36 = vmul.f32 %v360_v35, %v345_v27  ;;  %v82_v35 = vld [vmem:[%s2184_s0 + $0x28] sm:$0xff] }
 0x6c6   :  { %1455 = vmatmul.msk.f32.gmra.mxu0 %vm88_vm0, %v82_v35 }
 0x6c7   :  { %364 = vrot.lane.b32.xlu2 %v362_v36, %s1735_s12  ;;  %v715_v36 = vld [vmem:[%s2188_s4 + $0x8] sm:$0xff] }
 0x6c8   :  { %772 = vmatpush.msra.mxu3 %v715_v36 }
 0x721   :  { %v365_v37 = vpop.permute.xlu2 %364 }
 0x722   :  { %368 = vst.msk [vmem:[#allocation2 + $0x10] sm:$0xff] %vm163_vm8, %v365_v37  ;;  %1463 = vmatmul.msk.f32.vlgmr.msrb.gmra.mxu1 %vm163_vm8, %v365_v37  ;;  %v714_v37 = vld [vmem:[%s2188_s4] sm:$0xff] }
 0x723   :  { %773 = vmatpush.msra.mxu3 %v714_v37 }
 0x79f   :  { %v390_v40 = vpop.f32.mrf.mxu1 }
 0x7a0   :  { %v393_v41 = vadd.f32 %v390_v40, %v140_v39  ;;  %v723_v39 = vld [vmem:[#allocation2] sm:$0xff]  ;;  %v724_v40 = vld [vmem:[#allocation2 + $0x8] sm:$0xff] }
 0x7a2   :  { %v1464_v42 = vmul.f32 -1.442695, %v393_v41 }
 0x7a4   :  { %1547 = vpow2.f32 %v1464_v42 }
 0x7aa   :  { %v1548_v43 = vpop.eup %1547 }
 0x7ab   :  { %v398_v44 = vadd.f32 1.0, %v1548_v43 }
 0x7ad   :  { %1549 = vrcp.f32 %v398_v44  ;;  %v410_v48 = vand.u32 2147483648, %v398_v44  ;;  %v408_v50 = vand.u32 2147483647, %v398_v44  ;;  %vm404_vm3 = vweird.f32 %v398_v44 }
 0x7ae   :  { %1551 = vtanh.f32 %v393_v41  ;;  %v725_v41 = vld [vmem:[#allocation2 + $0x10] sm:$0xff] }
 0x7af   :  { %v411_v52 = vor.u32 1.1754944e-38, %v410_v48  ;;  %vm409_vm6 = vcmp.eq.f32.partialorder %v408_v50, 8.507059e+37 }
 0x7b3   :  { %v1550_v45 = vpop.eup %1549 }
 0x7b4   :  { %v400_v46 = vmul.f32 %v1550_v45, %v398_v44  ;;  %vm405_vm2 = vweird.f32 %v1550_v45  ;;  %v1552_v54 = vpop.eup %1551  ;;  %v145_v44 = vpop.f32.mrf.mxu0 }
 0x7b5   :  { %vm406_vm5 = vmor %vm404_vm3, %vm405_vm2 }
 0x7b6   :  { %v401_v47 = vsub.f32 1.0, %v400_v46 }
 0x7b8   :  { %v402_v49 = vmul.f32 %v1550_v45, %v401_v47 }
 0x7ba   :  { %v403_v51 = vadd.f32 %v1550_v45, %v402_v49 }
 0x7bc   :  { %v407_v53 = vsel %vm406_vm5, %v1550_v45, %v403_v51  ;;  %v146_v45 = vadd.f32 %v1861_v8, %v145_v44 }
 0x7bd   :  { %v412_v55 = vsel %vm409_vm6, %v411_v52, %v407_v53 }
 0x7be   :  { %v414_v56 = vsel %vm1864_vm4, %v1552_v54, %v412_v55 }
 0x7bf   :  { %417 = vrot.lane.b32.xlu0 %v414_v56, %s1734_s3  ;;  %v415_v59 = vmul.f32 %v414_v56, %v356_v32 }
 0x831   :  { %v418_v57 = vpop.permute.xlu0 %417 }
 0x832   :  { %v420_v58 = vmul.f32 %v418_v57, %v414_v56 }
 0x834   :  { %422 = vrot.lane.b32.xlu1 %v420_v58, %s1735_s12 }
 0x8a6   :  { %v423_v60 = vpop.permute.xlu1 %422 }
 0x8a7   :  { %v425_v61 = vadd.f32 %v423_v60, %v415_v59 }
 0x8a9   :  { %1553 = vtanh.f32 %v425_v61 }
 0x8af   :  { %v1554_v62 = vpop.eup %1553 }
 0x8b0   :  { %428 = vrot.lane.b32.xlu2 %v1554_v62, %s1734_s3 }
 0x90a   :  { %v429_v63 = vpop.permute.xlu2 %428 }
 0x90b   :  { %v431_v0 = vmul.f32 %v429_v63, %v414_v56 }
 0x90d   :  { %433 = vrot.lane.b32.xlu0 %v431_v0, %s1735_s12 }
 0x97f   :  { %v434_v2 = vpop.permute.xlu0 %433 }
 0x980   :  { %437 = vst.msk [vmem:[#allocation2 + $0x18] sm:$0xff] %vm163_vm8, %v434_v2  ;;  %1465 = vmatmul.msk.f32.vlgmr.msrb.gmra.mxu2 %vm163_vm8, %v434_v2 }
 0x987   :  { %v726_v42 = vld [vmem:[#allocation2 + $0x18] sm:$0xff] }
 0xa03   :  { %v459_v5 = vpop.f32.mrf.mxu2 }
 0xa04   :  { %v462_v6 = vadd.f32 %v459_v5, %v143_v4  ;;  %v83_v5 = vld [vmem:[%s2184_s0 + $0x30] sm:$0xff] }
 0xa05   :  { %1456 = vmatmul.msk.f32.gmra.mxu0 %vm88_vm0, %v83_v5 }
 0xa06   :  { %v1466_v9 = vmul.f32 -1.442695, %v462_v6 }
 0xa08   :  { %1555 = vpow2.f32 %v1466_v9 }
 0xa0e   :  { %v1556_v10 = vpop.eup %1555 }
 0xa0f   :  { %v467_v11 = vadd.f32 1.0, %v1556_v10  ;;  %v1967_v10 = vld [vmem:[#allocation4 + $0x18] sm:$0xff] }
 0xa10   :  { %820 = vmatpush.msrb.mxu1 %v1967_v10  ;;  %887 = vmatpush.msrb.mxu2 %v1967_v10 }
 0xa11   :  { %1557 = vrcp.f32 %v467_v11  ;;  %v479_v15 = vand.u32 2147483648, %v467_v11  ;;  %v477_v17 = vand.u32 2147483647, %v467_v11  ;;  %vm473_vm9 = vweird.f32 %v467_v11 }
 0xa12   :  { %1559 = vtanh.f32 %v462_v6 }
 0xa13   :  { %v480_v19 = vor.u32 1.1754944e-38, %v479_v15  ;;  %vm478_vm11 = vcmp.eq.f32.partialorder %v477_v17, 8.507059e+37 }
 0xa17   :  { %v1558_v12 = vpop.eup %1557 }
 0xa18   :  { %v469_v13 = vmul.f32 %v1558_v12, %v467_v11  ;;  %vm474_vm7 = vweird.f32 %v1558_v12  ;;  %v1560_v21 = vpop.eup %1559  ;;  %v1969_v11 = vld [vmem:[#allocation4 + $0x10] sm:$0xff] }
 0xa19   :  { %vm475_vm10 = vmor %vm473_vm9, %vm474_vm7  ;;  %821 = vmatpush.msrb.mxu1 %v1969_v11  ;;  %888 = vmatpush.msrb.mxu2 %v1969_v11 }
 0xa1a   :  { %v470_v14 = vsub.f32 1.0, %v469_v13  ;;  %v1977_v13 = vld [vmem:[#allocation4] sm:$0xff] }
 0xa1c   :  { %v471_v16 = vmul.f32 %v1558_v12, %v470_v14 }
 0xa1e   :  { %v472_v18 = vadd.f32 %v1558_v12, %v471_v16 }
 0xa20   :  { %v476_v20 = vsel %vm475_vm10, %v1558_v12, %v472_v18  ;;  %v1973_v12 = vld [vmem:[#allocation4 + $0x8] sm:$0xff] }
 0xa21   :  { %v481_v22 = vsel %vm478_vm11, %v480_v19, %v476_v20  ;;  %822 = vmatpush.msrb.mxu1 %v1973_v12  ;;  %889 = vmatpush.msrb.mxu2 %v1973_v12  ;;  %v1999_v20 = vld [vmem:[%s2190_s6] ss:$0 sm:$0xff] }
 0xa22   :  { %v483_v23 = vsel %vm1864_vm4, %v1560_v21, %v481_v22 }
 0xa23   :  { %486 = vrot.lane.b32.xlu1 %v483_v23, %s1734_s3  ;;  %v484_v27 = vmul.f32 %v483_v23, %v425_v61  ;;  %823 = vmatpush.msrb.mxu1 %v1977_v13 }
 0xa24   :  { %890 = vmatpush.msrb.mxu2 %v1977_v13 }
 0xa82   :  { %v148_v16 = vpop.f32.mrf.mxu0 }
 0xa83   :  { %v149_v17 = vadd.f32 %v1861_v8, %v148_v16  ;;  %v2030_v16 = vld [vmem:[#allocation7 + $0x8] sm:$0xff] }
 0xa95   :  { %v487_v25 = vpop.permute.xlu1 %486 }
 0xa96   :  { %v489_v26 = vmul.f32 %v487_v25, %v483_v23 }
 0xa98   :  { %491 = vrot.lane.b32.xlu2 %v489_v26, %s1735_s12 }
 0xaf2   :  { %v492_v28 = vpop.permute.xlu2 %491 }
 0xaf3   :  { %v494_v29 = vadd.f32 %v492_v28, %v484_v27 }
 0xaf5   :  { %1561 = vtanh.f32 %v494_v29 }
 0xafb   :  { %v1562_v30 = vpop.eup %1561 }
 0xafc   :  { %497 = vrot.lane.b32.xlu0 %v1562_v30, %s1734_s3 }
 0xb6e   :  { %v498_v31 = vpop.permute.xlu0 %497 }
 0xb6f   :  { %v500_v32 = vmul.f32 %v498_v31, %v483_v23 }
 0xb71   :  { %502 = vrot.lane.b32.xlu1 %v500_v32, %s1735_s12 }
 0xbe3   :  { %v503_v38 = vpop.permute.xlu1 %502 }
 0xbe4   :  { %506 = vst.msk [vmem:[#allocation2 + $0x20] sm:$0xff] %vm163_vm8, %v503_v38  ;;  %1467 = vmatmul.msk.f32.vlgmr.msrb.gmra.mxu3 %vm163_vm8, %v503_v38 }
 0xbeb   :  { %v727_v43 = vld [vmem:[#allocation2 + $0x20] sm:$0xff] }
 0xbec   :  { %1473 = vmatmul.msk.f32.vlgmr.msra.gmra.mxu3 %vm163_vm8, %v723_v39 }
 0xbf4   :  { %1474 = vmatmul.msk.f32.gmra.mxu3 %vm163_vm8, %v724_v40 }
 0xbfc   :  { %1475 = vmatmul.msk.f32.gmra.mxu3 %vm163_vm8, %v725_v41 }
 0xc04   :  { %1476 = vmatmul.msk.f32.gmra.mxu3 %vm163_vm8, %v726_v42 }
 0xc0c   :  { %1477 = vmatmul.msk.f32.gmra.mxu3 %vm163_vm8, %v727_v43 }
 0xc67   :  { %v528_v46 = vpop.f32.mrf.mxu3 }
 0xc68   :  { %v531_v47 = vadd.f32 %v528_v46, %v146_v45 }
 0xc6a   :  { %v1468_v48 = vmul.f32 -1.442695, %v531_v47 }
 0xc6c   :  { %1563 = vpow2.f32 %v1468_v48 }
 0xc72   :  { %v1564_v49 = vpop.eup %1563 }
 0xc73   :  { %v536_v50 = vadd.f32 1.0, %v1564_v49 }
 0xc75   :  { %1565 = vrcp.f32 %v536_v50  ;;  %v548_v54 = vand.u32 2147483648, %v536_v50  ;;  %v546_v56 = vand.u32 2147483647, %v536_v50  ;;  %vm542_vm13 = vweird.f32 %v536_v50 }
 0xc76   :  { %1567 = vtanh.f32 %v531_v47 }
 0xc77   :  { %v549_v58 = vor.u32 1.1754944e-38, %v548_v54  ;;  %vm547_vm15 = vcmp.eq.f32.partialorder %v546_v56, 8.507059e+37 }
 0xc7b   :  { %v1566_v51 = vpop.eup %1565 }
 0xc7c   :  { %v538_v52 = vmul.f32 %v1566_v51, %v536_v50  ;;  %vm543_vm12 = vweird.f32 %v1566_v51  ;;  %v1568_v60 = vpop.eup %1567 }
 0xc7d   :  { %vm544_vm14 = vmor %vm542_vm13, %vm543_vm12 }
 0xc7e   :  { %v539_v53 = vsub.f32 1.0, %v538_v52 }
 0xc80   :  { %v540_v55 = vmul.f32 %v1566_v51, %v539_v53 }
 0xc82   :  { %v541_v57 = vadd.f32 %v1566_v51, %v540_v55 }
 0xc84   :  { %v545_v59 = vsel %vm544_vm14, %v1566_v51, %v541_v57 }
 0xc85   :  { %v550_v61 = vsel %vm547_vm15, %v549_v58, %v545_v59 }
 0xc86   :  { %v552_v62 = vsel %vm1864_vm4, %v1568_v60, %v550_v61 }
 0xc87   :  { %555 = vrot.lane.b32.xlu2 %v552_v62, %s1734_s3  ;;  %v553_v1 = vmul.f32 %v552_v62, %v494_v29 }
 0xce1   :  { %v556_v63 = vpop.permute.xlu2 %555 }
 0xce2   :  { %v558_v0 = vmul.f32 %v556_v63, %v552_v62 }
 0xce4   :  { %560 = vrot.lane.b32.xlu0 %v558_v0, %s1735_s12 }
 0xd56   :  { %v561_v2 = vpop.permute.xlu0 %560 }
 0xd57   :  { %v1958_v3 = vadd.f32 %v561_v2, %v553_v1 }
 0xd59   :  { %1569 = vtanh.f32 %v1958_v3 }
 0xd5f   :  { %v1570_v4 = vpop.eup %1569 }
 0xd60   :  { %566 = vrot.lane.b32.xlu1 %v1570_v4, %s1734_s3 }
 0xdd2   :  { %v567_v6 = vpop.permute.xlu1 %566 }
 0xdd3   :  { %v569_v9 = vmul.f32 %v567_v6, %v552_v62 }
 0xdd5   :  { %571 = vrot.lane.b32.xlu2 %v569_v9, %s1735_s12  ;;  %v84_v9 = vld [vmem:[%s2184_s0 + $0x38] sm:$0xff] }
 0xdd6   :  { %1457 = vmatmul.msk.f32.gmra.mxu0 %vm88_vm0, %v84_v9 }
 0xe2f   :  { %v572_v14 = vpop.permute.xlu2 %571 }
 0xe30   :  { %575 = vst.msk [vmem:[#allocation2 + $0x28] sm:$0xff] %vm163_vm8, %v572_v14  ;;  %1469 = vmatmul.msk.f32.vlgmr.msra.gmra.mxu1 %vm163_vm8, %v572_v14  ;;  %v2025_v14 = vld [vmem:[#allocation7 + $0x18] sm:$0xff] }
 0xe31   :  { %954 = vmatpush.msra.mxu1 %v1967_v10  ;;  %1393 = vmatpush.msrb.mxu0 %v2025_v14 }
 0xe33   :  { %955 = vmatpush.msra.mxu1 %v1969_v11 }
 0xe35   :  { %956 = vmatpush.msra.mxu1 %v1973_v12 }
 0xe37   :  { %v728_v15 = vld [vmem:[#allocation2 + $0x28] sm:$0xff]  ;;  %957 = vmatpush.msra.mxu1 %v1977_v13 }
 0xe38   :  { %1478 = vmatmul.msk.f32.gmra.mxu3 %vm163_vm8, %v728_v15  ;;  %824 = vmatmul.f32.vlgmr.msrb.gmra.mxu1 %v1733_v7  ;;  %v775_v7 = vpop.f32.mrf.mxu3  ;;  %v2027_v15 = vld [vmem:[#allocation7 + $0x10] sm:$0xff] }
 0xe39   :  { %1088 = vmatpush.msrb.mxu1 %v1967_v10  ;;  %v776_v22 = vadd.f32 %v1999_v20, %v775_v7  ;;  %1394 = vmatpush.msrb.mxu0 %v2027_v15 }
 0xe3b   :  { %1089 = vmatpush.msrb.mxu1 %v1969_v11  ;;  %1395 = vmatpush.msrb.mxu0 %v2030_v16 }
 0xe3d   :  { %1090 = vmatpush.msrb.mxu1 %v1973_v12 }
 0xe3f   :  { %1091 = vmatpush.msrb.mxu1 %v1977_v13 }
 0xead   :  { %v597_v18 = vpop.f32.mrf.mxu1 }
 0xeae   :  { %v600_v19 = vadd.f32 %v597_v18, %v149_v17  ;;  %v2033_v17 = vld [vmem:[#allocation7] sm:$0xff] }
 0xeaf   :  { %1396 = vmatpush.msrb.mxu0 %v2033_v17 }
 0xeb0   :  { %v1470_v21 = vmul.f32 -1.442695, %v600_v19 }
 0xeb2   :  { %1571 = vpow2.f32 %v1470_v21 }
 0xeb5   :  { %v825_v23 = vpop.f32.mrf.mxu1 }
 0xeb6   :  { %v828_v25 = vadd.f32 %v825_v23, %v776_v22  ;;  %v151_v22 = vpop.f32.mrf.mxu0 }
 0xeb7   :  { %v152_v23 = vadd.f32 %v1861_v8, %v151_v22 }
 0xeb8   :  { %v1572_v26 = vpop.eup %1571  ;;  %v1481_v27 = vmul.f32 -1.442695, %v828_v25 }
 0xeb9   :  { %v605_v28 = vadd.f32 1.0, %v1572_v26 }
 0xeba   :  { %1573 = vpow2.f32 %v1481_v27  ;;  %v778_v27 = vpop.f32.mrf.mxu3 }
 0xebb   :  { %1575 = vrcp.f32 %v605_v28  ;;  %v617_v34 = vand.u32 2147483648, %v605_v28  ;;  %v615_v36 = vand.u32 2147483647, %v605_v28  ;;  %vm611_vm2 = vweird.f32 %v605_v28 }
 0xebd   :  { %v618_v39 = vor.u32 1.1754944e-38, %v617_v34  ;;  %vm616_vm5 = vcmp.eq.f32.partialorder %v615_v36, 8.507059e+37 }
 0xec0   :  { %v1574_v29 = vpop.eup %1573 }
 0xec1   :  { %v1576_v30 = vpop.eup %1575  ;;  %v833_v31 = vadd.f32 1.0, %v1574_v29  ;;  %v2058_v29 = vld [vmem:[%s2192_s8] ss:$0 sm:$0xff]  ;;  %s1736_s8 = smov [#allocation9]  }
 0xec2   :  { %v607_v32 = vmul.f32 %v1576_v30, %v605_v28  ;;  %vm612_vm1 = vweird.f32 %v1576_v30  ;;  %v779_v28 = vadd.f32 %v1999_v20, %v778_v27  ;;  %s1434_s14 = sshll.u32 %s1736_s8, 4  ;;  %s1435_s14 = int_to_ptr.vmem [resolvable:$true] %s1434_s14 }
 0xec3   :  { %1577 = vrcp.f32 %v833_v31  ;;  %vm613_vm3 = vmor %vm611_vm2, %vm612_vm1  ;;  %v845_v46 = vand.u32 2147483648, %v833_v31  ;;  %v843_v48 = vand.u32 2147483647, %v833_v31  ;;  %vm839_vm7 = vweird.f32 %v833_v31 }
 0xec4   :  { %v608_v33 = vsub.f32 1.0, %v607_v32  ;;  %1579 = vtanh.f32 %v600_v19 }
 0xec5   :  { %1581 = vtanh.f32 %v828_v25  ;;  %v846_v50 = vor.u32 1.1754944e-38, %v845_v46  ;;  %vm844_vm10 = vcmp.eq.f32.partialorder %v843_v48, 8.507059e+37 }
 0xec6   :  { %v609_v35 = vmul.f32 %v1576_v30, %v608_v33 }
 0xec8   :  { %v610_v37 = vadd.f32 %v1576_v30, %v609_v35 }
 0xec9   :  { %v1578_v38 = vpop.eup %1577 }
 0xeca   :  { %v614_v40 = vsel %vm613_vm3, %v1576_v30, %v610_v37  ;;  %v835_v41 = vmul.f32 %v1578_v38, %v833_v31  ;;  %v1580_v42 = vpop.eup %1579  ;;  %vm840_vm6 = vweird.f32 %v1578_v38 }
 0xecb   :  { %v619_v43 = vsel %vm616_vm5, %v618_v39, %v614_v40  ;;  %vm841_vm9 = vmor %vm839_vm7, %vm840_vm6  ;;  %v1582_v52 = vpop.eup %1581 }
 0xecc   :  { %v621_v44 = vsel %vm1864_vm4, %v1580_v42, %v619_v43  ;;  %v836_v45 = vsub.f32 1.0, %v835_v41 }
 0xecd   :  { %624 = vrot.lane.b32.xlu0 %v621_v44, %s1734_s3  ;;  %v622_v59 = vmul.f32 %v621_v44, %v1958_v3 }
 0xece   :  { %v837_v47 = vmul.f32 %v1578_v38, %v836_v45 }
 0xed0   :  { %v838_v49 = vadd.f32 %v1578_v38, %v837_v47 }
 0xed2   :  { %v842_v51 = vsel %vm841_vm9, %v1578_v38, %v838_v49 }
 0xed3   :  { %v847_v53 = vsel %vm844_vm10, %v846_v50, %v842_v51 }
 0xed4   :  { %v849_v54 = vsel %vm1864_vm4, %v1582_v52, %v847_v53 }
 0xed5   :  { %852 = vrot.lane.b32.xlu1 %v849_v54, %s1734_s3  ;;  %v850_v63 = vmul.f32 0.0, %v849_v54 }
 0xf3f   :  { %v625_v55 = vpop.permute.xlu0 %624 }
 0xf40   :  { %v627_v56 = vmul.f32 %v625_v55, %v621_v44 }
 0xf42   :  { %629 = vrot.lane.b32.xlu2 %v627_v56, %s1735_s12 }
 0xf47   :  { %v853_v57 = vpop.permute.xlu1 %852 }
 0xf48   :  { %v855_v58 = vmul.f32 %v853_v57, %v849_v54 }
 0xf4a   :  { %857 = vrot.lane.b32.xlu0 %v855_v58, %s1735_s12  ;;  %v781_v58 = vpop.f32.mrf.mxu3 }
 0xf9c   :  { %v630_v60 = vpop.permute.xlu2 %629 }
 0xf9d   :  { %v2011_v61 = vadd.f32 %v630_v60, %v622_v59  ;;  %v782_v59 = vadd.f32 %v1999_v20, %v781_v58 }
 0xf9f   :  { %1583 = vtanh.f32 %v2011_v61 }
 0xfa5   :  { %v1584_v62 = vpop.eup %1583 }
 0xfa6   :  { %635 = vrot.lane.b32.xlu1 %v1584_v62, %s1734_s3 }
 0xfbc   :  { %v858_v0 = vpop.permute.xlu0 %857 }
 0xfbd   :  { %v2015_v1 = vadd.f32 %v858_v0, %v850_v63 }
 0xfbf   :  { %1585 = vtanh.f32 %v2015_v1 }
 0xfc5   :  { %v1586_v2 = vpop.eup %1585 }
 0xfc6   :  { %863 = vrot.lane.b32.xlu2 %v1586_v2, %s1734_s3 }
0x1018   :  { %v636_v4 = vpop.permute.xlu1 %635 }
0x1019   :  { %v638_v5 = vmul.f32 %v636_v4, %v621_v44 }
0x101b   :  { %640 = vrot.lane.b32.xlu0 %v638_v5, %s1735_s12 }
0x1020   :  { %v864_v3 = vpop.permute.xlu2 %863 }
0x1021   :  { %v866_v6 = vmul.f32 %v864_v3, %v849_v54 }
0x1023   :  { %868 = vrot.lane.b32.xlu1 %v866_v6, %s1735_s12 }
0x108d   :  { %v641_v18 = vpop.permute.xlu0 %640 }
0x108e   :  { %644 = vst.msk [vmem:[#allocation2 + $0x30] sm:$0xff] %vm163_vm8, %v641_v18  ;;  %1471 = vmatmul.msk.f32.vlgmr.msra.gmra.mxu2 %vm163_vm8, %v641_v18 }
0x108f   :  { %1021 = vmatpush.msra.mxu2 %v1967_v10 }
0x1091   :  { %1022 = vmatpush.msra.mxu2 %v1969_v11 }
0x1093   :  { %1023 = vmatpush.msra.mxu2 %v1973_v12 }
0x1095   :  { %v869_v19 = vpop.permute.xlu1 %868  ;;  %v729_v21 = vld [vmem:[#allocation2 + $0x30] sm:$0xff]  ;;  %1024 = vmatpush.msra.mxu2 %v1977_v13 }
0x1096   :  { %871 = vst.msk [vmem:[#allocation2] sm:$0xff] %vm163_vm8, %v869_v19  ;;  %1479 = vmatmul.msk.f32.gmra.mxu3 %vm163_vm8, %v729_v21  ;;  %1482 = vmatmul.msk.f32.vlgmr.msrb.gmra.mxu2 %vm163_vm8, %v869_v19 }
0x1097   :  { %1155 = vmatpush.msrb.mxu2 %v1967_v10 }
0x1099   :  { %1156 = vmatpush.msrb.mxu2 %v1969_v11 }
0x109b   :  { %1157 = vmatpush.msrb.mxu2 %v1973_v12 }
0x109d   :  { %v1346_v7 = vld [vmem:[#allocation2] sm:$0xff]  ;;  %1158 = vmatpush.msrb.mxu2 %v1977_v13 }
0x109e   :  { %1496 = vmatmul.msk.f32.vlgmr.msrb.gmra.mxu0 %vm163_vm8, %v1346_v7 }
0x1111   :  { %v666_v25 = vpop.f32.mrf.mxu2 }
0x1112   :  { %v2052_v26 = vadd.f32 %v666_v25, %v152_v23 }
0x1119   :  { %v892_v30 = vpop.f32.mrf.mxu2 }
0x111a   :  { %v895_v31 = vadd.f32 %v892_v30, %v779_v28 }
0x111b   :  { %v1398_v32 = vpop.f32.mrf.mxu0 }
0x111c   :  { %v1483_v33 = vmul.f32 -1.442695, %v895_v31  ;;  %v1399_v34 = vadd.f32 %v2058_v29, %v1398_v32 }
0x111e   :  { %1587 = vpow2.f32 %v1483_v33  ;;  %1422 = vst [vmem:[#allocation9] sm:$0xff] %v1399_v34 }
0x1124   :  { %v1588_v8 = vpop.eup %1587 }
0x1125   :  { %v900_v35 = vadd.f32 1.0, %v1588_v8 }
0x1127   :  { %1589 = vrcp.f32 %v900_v35  ;;  %v912_v39 = vand.u32 2147483648, %v900_v35  ;;  %v910_v41 = vand.u32 2147483647, %v900_v35  ;;  %vm906_vm11 = vweird.f32 %v900_v35 }
0x1128   :  { %1591 = vtanh.f32 %v895_v31 }
0x1129   :  { %v913_v43 = vor.u32 1.1754944e-38, %v912_v39  ;;  %vm911_vm13 = vcmp.eq.f32.partialorder %v910_v41, 8.507059e+37 }
0x112d   :  { %v1590_v36 = vpop.eup %1589 }
0x112e   :  { %v902_v37 = vmul.f32 %v1590_v36, %v900_v35  ;;  %vm907_vm0 = vweird.f32 %v1590_v36  ;;  %v1592_v45 = vpop.eup %1591 }
0x112f   :  { %vm908_vm12 = vmor %vm906_vm11, %vm907_vm0 }
0x1130   :  { %v903_v38 = vsub.f32 1.0, %v902_v37  ;;  %v784_v37 = vpop.f32.mrf.mxu3 }
0x1132   :  { %v904_v40 = vmul.f32 %v1590_v36, %v903_v38  ;;  %v785_v38 = vadd.f32 %v1999_v20, %v784_v37 }
0x1134   :  { %v905_v42 = vadd.f32 %v1590_v36, %v904_v40 }
0x1136   :  { %v909_v44 = vsel %vm908_vm12, %v1590_v36, %v905_v42 }
0x1137   :  { %v914_v46 = vsel %vm911_vm13, %v913_v43, %v909_v44 }
0x1138   :  { %v916_v47 = vsel %vm1864_vm4, %v1592_v45, %v914_v46 }
0x1139   :  { %919 = vrot.lane.b32.xlu2 %v916_v47, %s1734_s3  ;;  %v917_v50 = vmul.f32 %v916_v47, %v2015_v1 }
0x1193   :  { %v920_v48 = vpop.permute.xlu2 %919 }
0x1194   :  { %v922_v49 = vmul.f32 %v920_v48, %v916_v47 }
0x1196   :  { %924 = vrot.lane.b32.xlu0 %v922_v49, %s1735_s12 }
0x1208   :  { %v925_v51 = vpop.permute.xlu0 %924 }
0x1209   :  { %v927_v52 = vadd.f32 %v925_v51, %v917_v50 }
0x120b   :  { %1593 = vtanh.f32 %v927_v52 }
0x1211   :  { %v1594_v53 = vpop.eup %1593 }
0x1212   :  { %930 = vrot.lane.b32.xlu1 %v1594_v53, %s1734_s3 }
0x1284   :  { %v931_v54 = vpop.permute.xlu1 %930 }
0x1285   :  { %v933_v55 = vmul.f32 %v931_v54, %v916_v47 }
0x1287   :  { %935 = vrot.lane.b32.xlu2 %v933_v55, %s1735_s12 }
0x12e1   :  { %v936_v56 = vpop.permute.xlu2 %935 }
0x12e2   :  { %938 = vst.msk [vmem:[#allocation2 + $0x8] sm:$0xff] %vm163_vm8, %v936_v56  ;;  %1484 = vmatmul.msk.f32.vlgmr.msra.gmra.mxu1 %vm163_vm8, %v936_v56 }
0x12e3   :  { %1222 = vmatpush.msra.mxu1 %v1967_v10 }
0x12e5   :  { %1223 = vmatpush.msra.mxu1 %v1969_v11 }
0x12e7   :  { %1224 = vmatpush.msra.mxu1 %v1973_v12 }
0x12e9   :  { %v1347_v57 = vld [vmem:[#allocation2 + $0x8] sm:$0xff]  ;;  %1225 = vmatpush.msra.mxu1 %v1977_v13 }
0x12ea   :  { %1497 = vmatmul.msk.f32.gmra.mxu0 %vm163_vm8, %v1347_v57 }
0x135f   :  { %v959_v60 = vpop.f32.mrf.mxu1 }
0x1360   :  { %v962_v62 = vadd.f32 %v959_v60, %v782_v59 }
0x1362   :  { %v1485_v63 = vmul.f32 -1.442695, %v962_v62 }
0x1364   :  { %1595 = vpow2.f32 %v1485_v63 }
0x1367   :  { %v1401_v0 = vpop.f32.mrf.mxu0 }
0x1368   :  { %v1402_v1 = vadd.f32 %v2058_v29, %v1401_v0 }
0x136a   :  { %v1596_v2 = vpop.eup %1595  ;;  %1423 = vst [vmem:[#allocation9 + $0x8] sm:$0xff] %v1402_v1 }
0x136b   :  { %v967_v4 = vadd.f32 1.0, %v1596_v2 }
0x136d   :  { %1597 = vrcp.f32 %v967_v4  ;;  %v979_v9 = vand.u32 2147483648, %v967_v4  ;;  %v977_v19 = vand.u32 2147483647, %v967_v4  ;;  %vm973_vm15 = vweird.f32 %v967_v4 }
0x136e   :  { %1599 = vtanh.f32 %v962_v62  ;;  %v787_v62 = vpop.f32.mrf.mxu3 }
0x136f   :  { %v980_v7 = vor.u32 1.1754944e-38, %v979_v9  ;;  %vm978_vm2 = vcmp.eq.f32.partialorder %v977_v19, 8.507059e+37  ;;  %v788_v63 = vadd.f32 %v1999_v20, %v787_v62 }
0x1373   :  { %v1598_v5 = vpop.eup %1597 }
0x1374   :  { %v969_v3 = vmul.f32 %v1598_v5, %v967_v4  ;;  %vm974_vm14 = vweird.f32 %v1598_v5  ;;  %v1600_v23 = vpop.eup %1599 }
0x1375   :  { %vm975_vm1 = vmor %vm973_vm15, %vm974_vm14 }
0x1376   :  { %v970_v6 = vsub.f32 1.0, %v969_v3 }
0x1378   :  { %v971_v18 = vmul.f32 %v1598_v5, %v970_v6 }
0x137a   :  { %v972_v21 = vadd.f32 %v1598_v5, %v971_v18 }
0x137c   :  { %v976_v22 = vsel %vm975_vm1, %v1598_v5, %v972_v21 }
0x137d   :  { %v981_v25 = vsel %vm978_vm2, %v980_v7, %v976_v22 }
0x137e   :  { %v983_v27 = vsel %vm1864_vm4, %v1600_v23, %v981_v25 }
0x137f   :  { %986 = vrot.lane.b32.xlu0 %v983_v27, %s1734_s3  ;;  %v984_v31 = vmul.f32 %v983_v27, %v927_v52 }
0x13f1   :  { %v987_v28 = vpop.permute.xlu0 %986 }
0x13f2   :  { %v989_v30 = vmul.f32 %v987_v28, %v983_v27 }
0x13f4   :  { %991 = vrot.lane.b32.xlu1 %v989_v30, %s1735_s12 }
0x1466   :  { %v992_v32 = vpop.permute.xlu1 %991 }
0x1467   :  { %v994_v33 = vadd.f32 %v992_v32, %v984_v31 }
0x1469   :  { %1601 = vtanh.f32 %v994_v33 }
0x146f   :  { %v1602_v34 = vpop.eup %1601 }
0x1470   :  { %997 = vrot.lane.b32.xlu2 %v1602_v34, %s1734_s3 }
0x14ca   :  { %v998_v8 = vpop.permute.xlu2 %997 }
0x14cb   :  { %v1000_v35 = vmul.f32 %v998_v8, %v983_v27 }
0x14cd   :  { %1002 = vrot.lane.b32.xlu0 %v1000_v35, %s1735_s12 }
0x153f   :  { %v1003_v36 = vpop.permute.xlu0 %1002 }
0x1540   :  { %1005 = vst.msk [vmem:[#allocation2 + $0x10] sm:$0xff] %vm163_vm8, %v1003_v36  ;;  %1486 = vmatmul.msk.f32.vlgmr.msra.gmra.mxu2 %vm163_vm8, %v1003_v36 }
0x1541   :  { %1289 = vmatpush.msra.mxu2 %v1967_v10 }
0x1543   :  { %1290 = vmatpush.msra.mxu2 %v1969_v11 }
0x1545   :  { %1291 = vmatpush.msra.mxu2 %v1973_v12 }
0x1547   :  { %1292 = vmatpush.msra.mxu2 %v1977_v13 }
0x15c3   :  { %v1026_v39 = vpop.f32.mrf.mxu2 }
0x15c4   :  { %v1029_v40 = vadd.f32 %v1026_v39, %v785_v38  ;;  %v790_v38 = vpop.f32.mrf.mxu3 }
0x15c5   :  { %v791_v39 = vadd.f32 %v1999_v20, %v790_v38 }
0x15c6   :  { %v1487_v41 = vmul.f32 -1.442695, %v1029_v40 }
0x15c8   :  { %1603 = vpow2.f32 %v1487_v41 }
0x15ce   :  { %v1604_v42 = vpop.eup %1603 }
0x15cf   :  { %v1034_v43 = vadd.f32 1.0, %v1604_v42 }
0x15d1   :  { %1605 = vrcp.f32 %v1034_v43  ;;  %v1046_v10 = vand.u32 2147483648, %v1034_v43  ;;  %v1044_v12 = vand.u32 2147483647, %v1034_v43  ;;  %vm1040_vm5 = vweird.f32 %v1034_v43 }
0x15d2   :  { %1607 = vtanh.f32 %v1029_v40 }
0x15d3   :  { %v1047_v13 = vor.u32 1.1754944e-38, %v1046_v10  ;;  %vm1045_vm7 = vcmp.eq.f32.partialorder %v1044_v12, 8.507059e+37 }
0x15d7   :  { %v1606_v44 = vpop.eup %1605 }
0x15d8   :  { %v1036_v45 = vmul.f32 %v1606_v44, %v1034_v43  ;;  %vm1041_vm3 = vweird.f32 %v1606_v44  ;;  %v1608_v49 = vpop.eup %1607 }
0x15d9   :  { %vm1042_vm6 = vmor %vm1040_vm5, %vm1041_vm3 }
0x15da   :  { %v1037_v46 = vsub.f32 1.0, %v1036_v45 }
0x15dc   :  { %v1038_v11 = vmul.f32 %v1606_v44, %v1037_v46 }
0x15de   :  { %v1039_v47 = vadd.f32 %v1606_v44, %v1038_v11 }
0x15e0   :  { %v1043_v48 = vsel %vm1042_vm6, %v1606_v44, %v1039_v47 }
0x15e1   :  { %v1048_v50 = vsel %vm1045_vm7, %v1047_v13, %v1043_v48 }
0x15e2   :  { %v1050_v51 = vsel %vm1864_vm4, %v1608_v49, %v1048_v50  ;;  %v1472_v49 = vmul.f32 -1.442695, %v2052_v26 }
0x15e3   :  { %1053 = vrot.lane.b32.xlu1 %v1050_v51, %s1734_s3  ;;  %v1051_v54 = vmul.f32 %v1050_v51, %v994_v33 }
0x1655   :  { %v1054_v52 = vpop.permute.xlu1 %1053 }
0x1656   :  { %v1056_v53 = vmul.f32 %v1054_v52, %v1050_v51 }
0x1658   :  { %1058 = vrot.lane.b32.xlu2 %v1056_v53, %s1735_s12 }
0x16b2   :  { %v1059_v55 = vpop.permute.xlu2 %1058 }
0x16b3   :  { %v1061_v56 = vadd.f32 %v1059_v55, %v1051_v54 }
0x16b5   :  { %1609 = vtanh.f32 %v1061_v56 }
0x16bb   :  { %v1610_v57 = vpop.eup %1609 }
0x16bc   :  { %1064 = vrot.lane.b32.xlu0 %v1610_v57, %s1734_s3 }
0x172e   :  { %v1065_v58 = vpop.permute.xlu0 %1064 }
0x172f   :  { %v1067_v59 = vmul.f32 %v1065_v58, %v1050_v51 }
0x1731   :  { %1069 = vrot.lane.b32.xlu1 %v1067_v59, %s1735_s12 }
0x17a3   :  { %v1070_v60 = vpop.permute.xlu1 %1069 }
0x17a4   :  { %1072 = vst.msk [vmem:[#allocation2 + $0x18] sm:$0xff] %vm163_vm8, %v1070_v60  ;;  %1488 = vmatmul.msk.f32.vlgmr.msrb.gmra.mxu1 %vm163_vm8, %v1070_v60 }
0x17a5   :  { %1504 = vmatpush.msrb.mxu1 %v2025_v14 }
0x17a7   :  { %1506 = vmatpush.msrb.mxu1 %v2027_v15 }
0x17a9   :  { %1508 = vmatpush.msrb.mxu1 %v2030_v16 }
0x17ab   :  { %1510 = vmatpush.msrb.mxu1 %v2033_v17 }
0x1821   :  { %v1093_v0 = vpop.f32.mrf.mxu1 }
0x1822   :  { %v1096_v1 = vadd.f32 %v1093_v0, %v788_v63 }
0x1824   :  { %v1489_v2 = vmul.f32 -1.442695, %v1096_v1 }
0x1826   :  { %1611 = vpow2.f32 %v1489_v2 }
0x182c   :  { %v1612_v4 = vpop.eup %1611 }
0x182d   :  { %v1101_v5 = vadd.f32 1.0, %v1612_v4 }
0x182f   :  { %1613 = vrcp.f32 %v1101_v5  ;;  %v1113_v18 = vand.u32 2147483648, %v1101_v5  ;;  %v1111_v21 = vand.u32 2147483647, %v1101_v5  ;;  %vm1107_vm10 = vweird.f32 %v1101_v5 }
0x1830   :  { %1615 = vtanh.f32 %v1096_v1 }
0x1831   :  { %v1114_v22 = vor.u32 1.1754944e-38, %v1113_v18  ;;  %vm1112_vm11 = vcmp.eq.f32.partialorder %v1111_v21, 8.507059e+37 }
0x1835   :  { %v1614_v3 = vpop.eup %1613 }
0x1836   :  { %v1103_v6 = vmul.f32 %v1614_v3, %v1101_v5  ;;  %vm1108_vm9 = vweird.f32 %v1614_v3  ;;  %v1616_v25 = vpop.eup %1615 }
0x1837   :  { %vm1109_vm0 = vmor %vm1107_vm10, %vm1108_vm9 }
0x1838   :  { %v1104_v9 = vsub.f32 1.0, %v1103_v6 }
0x183a   :  { %v1105_v19 = vmul.f32 %v1614_v3, %v1104_v9 }
0x183c   :  { %v1106_v7 = vadd.f32 %v1614_v3, %v1105_v19 }
0x183e   :  { %v1110_v23 = vsel %vm1109_vm0, %v1614_v3, %v1106_v7  ;;  %v1348_v7 = vld [vmem:[#allocation2 + $0x10] sm:$0xff] }
0x183f   :  { %v1115_v27 = vsel %vm1112_vm11, %v1114_v22, %v1110_v23  ;;  %v1349_v22 = vld [vmem:[#allocation2 + $0x18] sm:$0xff] }
0x1840   :  { %v1117_v28 = vsel %vm1864_vm4, %v1616_v25, %v1115_v27  ;;  %v793_v25 = vpop.f32.mrf.mxu3 }
0x1841   :  { %1120 = vrot.lane.b32.xlu2 %v1117_v28, %s1734_s3  ;;  %v1118_v32 = vmul.f32 %v1117_v28, %v1061_v56  ;;  %v794_v27 = vadd.f32 %v1999_v20, %v793_v25 }
0x189b   :  { %v1121_v30 = vpop.permute.xlu2 %1120 }
0x189c   :  { %v1123_v31 = vmul.f32 %v1121_v30, %v1117_v28 }
0x189e   :  { %1125 = vrot.lane.b32.xlu0 %v1123_v31, %s1735_s12 }
0x1910   :  { %v1126_v33 = vpop.permute.xlu0 %1125 }
0x1911   :  { %v2107_v34 = vadd.f32 %v1126_v33, %v1118_v32 }
0x1913   :  { %1617 = vtanh.f32 %v2107_v34 }
0x1919   :  { %v1618_v8 = vpop.eup %1617 }
0x191a   :  { %1131 = vrot.lane.b32.xlu1 %v1618_v8, %s1734_s3 }
0x198c   :  { %v1132_v35 = vpop.permute.xlu1 %1131 }
0x198d   :  { %v1134_v36 = vmul.f32 %v1132_v35, %v1117_v28 }
0x198f   :  { %1136 = vrot.lane.b32.xlu2 %v1134_v36, %s1735_s12 }
0x19e9   :  { %v1137_v37 = vpop.permute.xlu2 %1136 }
0x19ea   :  { %1139 = vst.msk [vmem:[#allocation2 + $0x20] sm:$0xff] %vm163_vm8, %v1137_v37  ;;  %1490 = vmatmul.msk.f32.vlgmr.msrb.gmra.mxu2 %vm163_vm8, %v1137_v37 }
0x19eb   :  { %1505 = vmatpush.msrb.mxu2 %v2025_v14 }
0x19ed   :  { %1507 = vmatpush.msrb.mxu2 %v2027_v15 }
0x19ef   :  { %1509 = vmatpush.msrb.mxu2 %v2030_v16 }
0x19f1   :  { %1511 = vmatpush.msrb.mxu2 %v2033_v17  ;;  %v1350_v23 = vld [vmem:[#allocation2 + $0x20] sm:$0xff] }
0x1a6d   :  { %v1160_v40 = vpop.f32.mrf.mxu2 }
0x1a6e   :  { %v1163_v41 = vadd.f32 %v1160_v40, %v791_v39 }
0x1a70   :  { %v1491_v42 = vmul.f32 -1.442695, %v1163_v41 }
0x1a72   :  { %1619 = vpow2.f32 %v1491_v42 }
0x1a78   :  { %v1620_v43 = vpop.eup %1619 }
0x1a79   :  { %v1168_v44 = vadd.f32 1.0, %v1620_v43 }
0x1a7b   :  { %1621 = vrcp.f32 %v1168_v44  ;;  %v1180_v14 = vand.u32 2147483648, %v1168_v44  ;;  %v1178_v16 = vand.u32 2147483647, %v1168_v44  ;;  %vm1174_vm13 = vweird.f32 %v1168_v44 }
0x1a7c   :  { %1623 = vtanh.f32 %v1163_v41 }
0x1a7d   :  { %v1181_v17 = vor.u32 1.1754944e-38, %v1180_v14  ;;  %vm1179_vm15 = vcmp.eq.f32.partialorder %v1178_v16, 8.507059e+37  ;;  %1625 = vpow2.f32 %v1472_v49 }
0x1a81   :  { %v1622_v45 = vpop.eup %1621 }
0x1a82   :  { %v1170_v46 = vmul.f32 %v1622_v45, %v1168_v44  ;;  %vm1175_vm12 = vweird.f32 %v1622_v45  ;;  %v1624_v47 = vpop.eup %1623 }
0x1a83   :  { %vm1176_vm14 = vmor %vm1174_vm13, %vm1175_vm12  ;;  %v1626_v50 = vpop.eup %1625 }
0x1a84   :  { %v1171_v10 = vsub.f32 1.0, %v1170_v46  ;;  %v674_v51 = vadd.f32 1.0, %v1626_v50 }
0x1a86   :  { %v1172_v15 = vmul.f32 %v1622_v45, %v1171_v10  ;;  %1627 = vrcp.f32 %v674_v51  ;;  %v686_v59 = vand.u32 2147483648, %v674_v51  ;;  %vm680_vm2 = vweird.f32 %v674_v51 }
0x1a87   :  { %v684_v60 = vand.u32 2147483647, %v674_v51  ;;  %1629 = vtanh.f32 %v2052_v26 }
0x1a88   :  { %v1173_v11 = vadd.f32 %v1622_v45, %v1172_v15  ;;  %v687_v63 = vor.u32 1.1754944e-38, %v686_v59 }
0x1a89   :  { %vm685_vm5 = vcmp.eq.f32.partialorder %v684_v60, 8.507059e+37 }
0x1a8a   :  { %v1177_v12 = vsel %vm1176_vm14, %v1622_v45, %v1173_v11 }
0x1a8b   :  { %v1182_v13 = vsel %vm1179_vm15, %v1181_v17, %v1177_v12 }
0x1a8c   :  { %v1184_v48 = vsel %vm1864_vm4, %v1624_v47, %v1182_v13  ;;  %v1628_v52 = vpop.eup %1627 }
0x1a8d   :  { %1187 = vrot.lane.b32.xlu0 %v1184_v48, %s1734_s3  ;;  %v676_v53 = vmul.f32 %v1628_v52, %v674_v51  ;;  %vm681_vm1 = vweird.f32 %v1628_v52  ;;  %v1630_v1 = vpop.eup %1629  ;;  %v1185_v4 = vmul.f32 %v1184_v48, %v2107_v34 }
0x1a8e   :  { %vm682_vm3 = vmor %vm680_vm2, %vm681_vm1 }
0x1a8f   :  { %v677_v54 = vsub.f32 1.0, %v676_v53 }
0x1a91   :  { %v678_v55 = vmul.f32 %v1628_v52, %v677_v54 }
0x1a93   :  { %v679_v57 = vadd.f32 %v1628_v52, %v678_v55 }
0x1a95   :  { %v683_v62 = vsel %vm682_vm3, %v1628_v52, %v679_v57 }
0x1a96   :  { %v688_v0 = vsel %vm685_vm5, %v687_v63, %v683_v62 }
0x1a97   :  { %v2127_v2 = vsel %vm1864_vm4, %v1630_v1, %v688_v0 }
0x1a98   :  { %v691_v46 = vmul.f32 %v2127_v2, %v2011_v61 }
0x1aff   :  { %v1188_v56 = vpop.permute.xlu0 %1187 }
0x1b00   :  { %v1190_v58 = vmul.f32 %v1188_v56, %v1184_v48 }
0x1b02   :  { %1192 = vrot.lane.b32.xlu1 %v1190_v58, %s1735_s12 }
0x1b0a   :  { %693 = vrot.lane.b32.xlu1 %v2127_v2, %s1734_s3 }
0x1b74   :  { %v1193_v5 = vpop.permute.xlu1 %1192 }
0x1b75   :  { %v2132_v3 = vadd.f32 %v1193_v5, %v1185_v4 }
0x1b77   :  { %1631 = vtanh.f32 %v2132_v3 }
0x1b7c   :  { %v694_v18 = vpop.permute.xlu1 %693 }
0x1b7d   :  { %v1632_v26 = vpop.eup %1631  ;;  %v696_v19 = vmul.f32 %v694_v18, %v2127_v2 }
0x1b7e   :  { %1198 = vrot.lane.b32.xlu2 %v1632_v26, %s1734_s3 }
0x1bd8   :  { %v1199_v6 = vpop.permute.xlu2 %1198 }
0x1bd9   :  { %v1201_v9 = vmul.f32 %v1199_v6, %v1184_v48 }
0x1bdb   :  { %1203 = vrot.lane.b32.xlu0 %v1201_v9, %s1735_s12 }
0x1be3   :  { %698 = vrot.lane.b32.xlu0 %v696_v19, %s1735_s12 }
0x1c4d   :  { %v1204_v21 = vpop.permute.xlu0 %1203 }
0x1c4e   :  { %1206 = vst.msk [vmem:[#allocation2 + $0x28] sm:$0xff] %vm163_vm8, %v1204_v21  ;;  %1492 = vmatmul.msk.f32.vlgmr.msra.gmra.mxu1 %vm163_vm8, %v1204_v21 }
0x1c55   :  { %v699_v45 = vpop.permute.xlu0 %698  ;;  %v1351_v59 = vld [vmem:[#allocation2 + $0x28] sm:$0xff] }
0x1c56   :  { %1498 = vmatmul.msk.f32.vlgmr.msrb.gmra.mxu1 %vm163_vm8, %v1348_v7  ;;  %v701_v15 = vadd.f32 %v699_v45, %v691_v46 }
0x1c5e   :  { %1499 = vmatmul.msk.f32.gmra.mxu1 %vm163_vm8, %v1349_v22 }
0x1c66   :  { %1500 = vmatmul.msk.f32.gmra.mxu1 %vm163_vm8, %v1350_v23 }
0x1ccb   :  { %v1227_v28 = vpop.f32.mrf.mxu1 }
0x1ccc   :  { %v1230_v30 = vadd.f32 %v1227_v28, %v794_v27 }
0x1cce   :  { %v1493_v31 = vmul.f32 -1.442695, %v1230_v30 }
0x1cd0   :  { %1633 = vpow2.f32 %v1493_v31 }
0x1cd3   :  { %v1404_v32 = vpop.f32.mrf.mxu1 }
0x1cd4   :  { %v1405_v33 = vadd.f32 %v2058_v29, %v1404_v32 }
0x1cd6   :  { %v1634_v34 = vpop.eup %1633  ;;  %1424 = vst [vmem:[#allocation9 + $0x10] sm:$0xff] %v1405_v33 }
0x1cd7   :  { %v1235_v8 = vadd.f32 1.0, %v1634_v34 }
0x1cd9   :  { %1635 = vrcp.f32 %v1235_v8  ;;  %v1247_v41 = vand.u32 2147483648, %v1235_v8  ;;  %v1245_v44 = vand.u32 2147483647, %v1235_v8  ;;  %vm1241_vm7 = vweird.f32 %v1235_v8 }
0x1cda   :  { %1637 = vtanh.f32 %v1230_v30 }
0x1cdb   :  { %v1407_v35 = vpop.f32.mrf.mxu1  ;;  %v1248_v14 = vor.u32 1.1754944e-38, %v1247_v41  ;;  %vm1246_vm10 = vcmp.eq.f32.partialorder %v1245_v44, 8.507059e+37  ;;  %1639 = vtanh.f32 %v701_v15 }
0x1cdc   :  { %v1408_v36 = vadd.f32 %v2058_v29, %v1407_v35 }
0x1cde   :  { %1425 = vst [vmem:[#allocation9 + $0x18] sm:$0xff] %v1408_v36 }
0x1cdf   :  { %v1636_v37 = vpop.eup %1635 }
0x1ce0   :  { %v1237_v38 = vmul.f32 %v1636_v37, %v1235_v8  ;;  %vm1242_vm6 = vweird.f32 %v1636_v37  ;;  %v1638_v11 = vpop.eup %1637 }
0x1ce1   :  { %vm1243_vm9 = vmor %vm1241_vm7, %vm1242_vm6  ;;  %v1640_v47 = vpop.eup %1639 }
0x1ce2   :  { %v1238_v39 = vsub.f32 1.0, %v1237_v38 }
0x1ce3   :  { %v1410_v40 = vpop.f32.mrf.mxu1 }
0x1ce4   :  { %v1411_v42 = vadd.f32 %v2058_v29, %v1410_v40  ;;  %v1239_v43 = vmul.f32 %v1636_v37, %v1238_v39 }
0x1ce6   :  { %1426 = vst [vmem:[#allocation9 + $0x20] sm:$0xff] %v1411_v42  ;;  %v1240_v10 = vadd.f32 %v1636_v37, %v1239_v43 }
0x1ce8   :  { %v1244_v16 = vsel %vm1243_vm9, %v1636_v37, %v1240_v10 }
0x1ce9   :  { %v1249_v17 = vsel %vm1246_vm10, %v1248_v14, %v1244_v16 }
0x1cea   :  { %v1251_v12 = vsel %vm1864_vm4, %v1638_v11, %v1249_v17 }
0x1ceb   :  { %1254 = vrot.lane.b32.xlu2 %v1251_v12, %s1734_s3  ;;  %v1252_v50 = vmul.f32 %v1251_v12, %v2132_v3 }
0x1cf3   :  { %704 = vrot.lane.b32.xlu2 %v1640_v47, %s1734_s3 }
0x1d45   :  { %v1255_v61 = vpop.permute.xlu2 %1254 }
0x1d46   :  { %v1257_v13 = vmul.f32 %v1255_v61, %v1251_v12 }
0x1d48   :  { %1259 = vrot.lane.b32.xlu1 %v1257_v13, %s1735_s12 }
0x1d4d   :  { %v705_v48 = vpop.permute.xlu2 %704 }
0x1d4e   :  { %v707_v49 = vmul.f32 %v705_v48, %v2127_v2 }
0x1d50   :  { %709 = vrot.lane.b32.xlu1 %v707_v49, %s1735_s12 }
0x1dba   :  { %v1260_v51 = vpop.permute.xlu1 %1259 }
0x1dbb   :  { %v1262_v52 = vadd.f32 %v1260_v51, %v1252_v50 }
0x1dbd   :  { %1641 = vtanh.f32 %v1262_v52 }
0x1dc2   :  { %v710_v53 = vpop.permute.xlu1 %709 }
0x1dc3   :  { %v1642_v54 = vpop.eup %1641  ;;  %713 = vst.msk [vmem:[#allocation2 + $0x38] sm:$0xff] %vm163_vm8, %v710_v53 }
0x1dc4   :  { %1265 = vrot.lane.b32.xlu0 %v1642_v54, %s1734_s3 }
0x1dca   :  { %v730_v55 = vld [vmem:[#allocation2 + $0x38] sm:$0xff] }
0x1dcb   :  { %1480 = vmatmul.msk.f32.gmra.mxu3 %vm163_vm8, %v730_v55 }
0x1e36   :  { %v1266_v56 = vpop.permute.xlu0 %1265 }
0x1e37   :  { %v1268_v57 = vmul.f32 %v1266_v56, %v1251_v12 }
0x1e39   :  { %1270 = vrot.lane.b32.xlu2 %v1268_v57, %s1735_s12 }
0x1e4e   :  { %v796_v62 = vpop.f32.mrf.mxu3 }
0x1e4f   :  { %v797_v63 = vadd.f32 %v1999_v20, %v796_v62 }
0x1e93   :  { %v1271_v58 = vpop.permute.xlu2 %1270 }
0x1e94   :  { %1273 = vst.msk [vmem:[#allocation2 + $0x30] sm:$0xff] %vm163_vm8, %v1271_v58  ;;  %1494 = vmatmul.msk.f32.vlgmr.msra.gmra.mxu2 %vm163_vm8, %v1271_v58 }
0x1e9b   :  { %v1352_v60 = vld [vmem:[#allocation2 + $0x30] sm:$0xff] }
0x1e9c   :  { %1501 = vmatmul.msk.f32.vlgmr.msrb.gmra.mxu2 %vm163_vm8, %v1351_v59 }
0x1ea4   :  { %1502 = vmatmul.msk.f32.gmra.mxu2 %vm163_vm8, %v1352_v60 }
0x1f17   :  { %v1294_v0 = vpop.f32.mrf.mxu2 }
0x1f18   :  { %v1297_v1 = vadd.f32 %v1294_v0, %v797_v63 }
0x1f1a   :  { %v1495_v2 = vmul.f32 -1.442695, %v1297_v1 }
0x1f1c   :  { %1643 = vpow2.f32 %v1495_v2 }
0x1f1f   :  { %v1413_v4 = vpop.f32.mrf.mxu2 }
0x1f20   :  { %v1414_v5 = vadd.f32 %v2058_v29, %v1413_v4 }
0x1f22   :  { %v1644_v3 = vpop.eup %1643  ;;  %1427 = vst [vmem:[#allocation9 + $0x28] sm:$0xff] %v1414_v5 }
0x1f23   :  { %v1302_v26 = vadd.f32 1.0, %v1644_v3 }
0x1f25   :  { %1645 = vrcp.f32 %v1302_v26  ;;  %v1314_v20 = vand.u32 2147483648, %v1302_v26  ;;  %v1312_v22 = vand.u32 2147483647, %v1302_v26  ;;  %vm1308_vm11 = vweird.f32 %v1302_v26 }
0x1f26   :  { %1647 = vtanh.f32 %v1297_v1 }
0x1f27   :  { %v1416_v6 = vpop.f32.mrf.mxu2  ;;  %v1315_v25 = vor.u32 1.1754944e-38, %v1314_v20  ;;  %vm1313_vm13 = vcmp.eq.f32.partialorder %v1312_v22, 8.507059e+37 }
0x1f28   :  { %v1417_v9 = vadd.f32 %v2058_v29, %v1416_v6 }
0x1f2a   :  { %1428 = vst [vmem:[#allocation9 + $0x30] sm:$0xff] %v1417_v9 }
0x1f2b   :  { %v1646_v18 = vpop.eup %1645 }
0x1f2c   :  { %v1304_v19 = vmul.f32 %v1646_v18, %v1302_v26  ;;  %vm1309_vm0 = vweird.f32 %v1646_v18  ;;  %v1648_v28 = vpop.eup %1647 }
0x1f2d   :  { %vm1310_vm12 = vmor %vm1308_vm11, %vm1309_vm0 }
0x1f2e   :  { %v1305_v21 = vsub.f32 1.0, %v1304_v19 }
0x1f30   :  { %v1306_v7 = vmul.f32 %v1646_v18, %v1305_v21 }
0x1f32   :  { %v1307_v23 = vadd.f32 %v1646_v18, %v1306_v7 }
0x1f34   :  { %v1311_v27 = vsel %vm1310_vm12, %v1646_v18, %v1307_v23 }
0x1f35   :  { %v1316_v30 = vsel %vm1313_vm13, %v1315_v25, %v1311_v27 }
0x1f36   :  { %v1318_v31 = vsel %vm1864_vm4, %v1648_v28, %v1316_v30 }
0x1f37   :  { %1321 = vrot.lane.b32.xlu0 %v1318_v31, %s1734_s3  ;;  %v1319_v34 = vmul.f32 %v1318_v31, %v1262_v52 }
0x1fa9   :  { %v1322_v32 = vpop.permute.xlu0 %1321 }
0x1faa   :  { %v1324_v33 = vmul.f32 %v1322_v32, %v1318_v31 }
0x1fac   :  { %1326 = vrot.lane.b32.xlu1 %v1324_v33, %s1735_s12 }
0x201e   :  { %v1327_v8 = vpop.permute.xlu1 %1326 }
0x201f   :  { %v1329_v35 = vadd.f32 %v1327_v8, %v1319_v34 }
0x2021   :  { %1649 = vtanh.f32 %v1329_v35 }
0x2027   :  { %v1650_v36 = vpop.eup %1649 }
0x2028   :  { %1332 = vrot.lane.b32.xlu2 %v1650_v36, %s1734_s3 }
0x2082   :  { %v1333_v37 = vpop.permute.xlu2 %1332 }
0x2083   :  { %v1335_v38 = vmul.f32 %v1333_v37, %v1318_v31 }
0x2085   :  { %1337 = vrot.lane.b32.xlu0 %v1335_v38, %s1735_s12 }
0x20f7   :  { %v1338_v39 = vpop.permute.xlu0 %1337 }
0x20f8   :  { %1340 = vst.msk [vmem:[#allocation2 + $0x38] sm:$0xff] %vm163_vm8, %v1338_v39 }
0x20ff   :  { %v1353_v24 = vld [vmem:[#allocation2 + $0x38] sm:$0xff] }
0x2100   :  { %1503 = vmatmul.msk.f32.gmra.mxu2 %vm163_vm8, %v1353_v24 }
0x2183   :  { %v1419_v40 = vpop.f32.mrf.mxu2 }
0x2184   :  { %v1420_v41 = vadd.f32 %v2058_v29, %v1419_v40 }
0x2186   :  { %1429 = vst [vmem:[#allocation9 + $0x38] sm:$0xff] %v1420_v41 }
0x2187   :  { %1442 = dma.vmem_to_hbm [thread:$0]  %s1435_s14, 1024, %s1437_s19, [#allocation6], %s1730_s17, %s1730_s17, %s1731_s18  }
0x2188   :  { %1727 = dma.done.wait [#allocation6], 1024  }
0x2189   :  { %1728 = vsyncadd [#allocation6], 4294966272 }
0x218a   :  { %1447 = vsyncpa [#allocation5], 1 }
0x218b   :  { %1448 = vsyncpa [#allocation8], 1 }
0x218c   :  { %1449 = vsyncpa [#allocation6], 1 }

</bundles_post_ra>
